<compile_context>
chip_gen: v7x
topology: tpu7x:2x2x1
jax: 0.10.0
libtpu: 0.0.40
codegen_flags: <defaults>
</compile_context>

<pallas_src>
import jax
import jax.numpy as jnp
from jax.experimental import pallas as pl
from jax.experimental.pallas import tpu as pltpu

LANE = 128


# ----------------------------------------------------------------------------
# helpers
# ----------------------------------------------------------------------------
def _round_up(n, m):
    return ((n + m - 1) // m) * m


def _pad2d(a, rows, cols):
    r, c = a.shape
    return jnp.pad(a, ((0, rows - r), (0, cols - c)))


def _tpu_config():
    """Generation-aware tile targets + scoped-VMEM budget.
    v5e/v6e (128 MiB VMEM): big tiles, 96 MiB limit.
    v7x (64 MiB VMEM, 2.3x HBM BW): moderate tiles, 48 MiB limit."""
    vmem_cap = 64 * 1024 * 1024
    try:
        info = pltpu.get_tpu_info()
        vmem_cap = int(getattr(info, "vmem_capacity_bytes", vmem_cap))
    except Exception:
        pass
    if vmem_cap >= 100 * 1024 * 1024:
        return dict(target_tm=512, target_tk=4096, vmem_limit=96 * 1024 * 1024)
    return dict(target_tm=256, target_tk=2048, vmem_limit=48 * 1024 * 1024)


def _choose_tiles(N, target_tm, target_tk):
    """Row tile tm (dst) and reduction tile tk (src).  tk is a multiple of tm,
    so a single padded node count Np (multiple of tk) serves both axes of the
    square adjacency.  Padding rows/cols with zeros is exact."""
    tm = min(target_tm, _round_up(N, 128))      # multiple of 128 (bf16-safe)
    tk = min(target_tk, _round_up(N, tm))
    tk = max(tm, (tk // tm) * tm)               # multiple of tm
    Np = _round_up(N, tk)
    return tm, tk, Np


# ----------------------------------------------------------------------------
# prep kernel: projection xs = h @ W (only when in_feats > out_feats)
#   h already carries the dsrc scaling (invariant maintained by the epilogues).
# ----------------------------------------------------------------------------
def _prep_project_kernel(x_ref, w_ref, o_ref):
    o_ref[...] = jnp.dot(x_ref[...], w_ref[...],
                         preferred_element_type=jnp.float32).astype(o_ref.dtype)


def _prep_project(h_bf16, W_bf16, tm, vmem_limit):
    Np, fin_p = h_bf16.shape
    fout_p = W_bf16.shape[1]
    return pl.pallas_call(
        _prep_project_kernel,
        out_shape=jax.ShapeDtypeStruct((Np, fout_p), jnp.bfloat16),
        grid=(Np // tm,),
        in_specs=[pl.BlockSpec((tm, fin_p), lambda i: (i, 0)),
                  pl.BlockSpec((fin_p, fout_p), lambda i: (0, 0))],
        out_specs=pl.BlockSpec((tm, fout_p), lambda i: (i, 0)),
        compiler_params=pltpu.CompilerParams(
            dimension_semantics=("parallel",),
            vmem_limit_bytes=vmem_limit),
    )(h_bf16, W_bf16)


# ----------------------------------------------------------------------------
# tiled aggregation kernel: acc += A_tile @ xs_tile, fused epilogue on last k
# ----------------------------------------------------------------------------
def _make_agg_kernel(project_in_finalize: bool, relu: bool, fold_dsrc: bool):
    def kernel(*refs):
        a_ref, xs_ref = refs[0], refs[1]
        idx = 2
        if project_in_finalize:
            w_ref = refs[idx]; idx += 1
        else:
            w_ref = None
        ddst_ref = refs[idx]; idx += 1
        shift_ref = refs[idx]; idx += 1
        if fold_dsrc:
            dsrc_ref = refs[idx]; idx += 1
        else:
            dsrc_ref = None
        o_ref, acc_ref = refs[idx], refs[idx + 1]

        k = pl.program_id(1)

        @pl.when(k == 0)
        def _init():
            acc_ref[...] = jnp.zeros_like(acc_ref)

        # native bf16 x bf16 MXU matmul, f32 accumulation (no f32 upcast of A)
        acc_ref[...] += jnp.dot(a_ref[...], xs_ref[...],
                                preferred_element_type=jnp.float32)

        @pl.when(k == pl.num_programs(1) - 1)
        def _finalize():
            r = acc_ref[...]
            if project_in_finalize:
                # small once-per-row-tile f32 matmul (BN scale already in W)
                r = jnp.dot(r, w_ref[...], preferred_element_type=jnp.float32)
            r = r * ddst_ref[...] + shift_ref[...]     # ddst norm + bias/BN shift
            if relu:
                r = jnp.maximum(r, 0.0)
            if fold_dsrc:
                r = r * dsrc_ref[...]                  # pre-scale for next layer
            o_ref[...] = r.astype(o_ref.dtype)

    return kernel


def gcn_layer_pallas(A_bf16, h, Wp, shift, dsrc, ddst, *, weight_first, relu,
                     fold_dsrc, out_dtype, tm, tk, vmem_limit):
    """One fused GCN layer.  h:(Np,Fin_p) bf16 (already dsrc-scaled),
    Wp:(Fin_p,Fout_p) f32 with BN scale folded in."""
    Np = A_bf16.shape[0]
    fin_p = h.shape[1]
    fout_p = Wp.shape[1]

    if weight_first:
        xs = _prep_project(h, Wp.astype(jnp.bfloat16), tm, vmem_limit)
        facc = fout_p
    else:
        xs = h                     # no separate prep pass needed
        facc = fin_p

    kernel = _make_agg_kernel(project_in_finalize=not weight_first,
                              relu=relu, fold_dsrc=fold_dsrc)

    in_specs = [
        pl.BlockSpec((tm, tk), lambda i, k: (i, k)),       # A tile (bf16)
        pl.BlockSpec((tk, facc), lambda i, k: (k, 0)),     # xs tile (bf16)
    ]
    args = [A_bf16, xs]
    if not weight_first:
        in_specs.append(pl.BlockSpec((fin_p, fout_p), lambda i, k: (0, 0)))
        args.append(Wp)                                    # W resident (f32)
    in_specs.append(pl.BlockSpec((tm, 1), lambda i, k: (i, 0)))
    args.append(ddst)
    in_specs.append(pl.BlockSpec((1, fout_p), lambda i, k: (0, 0)))
    args.append(shift)
    if fold_dsrc:
        in_specs.append(pl.BlockSpec((tm, 1), lambda i, k: (i, 0)))
        args.append(dsrc)

    return pl.pallas_call(
        kernel,
        out_shape=jax.ShapeDtypeStruct((Np, fout_p), out_dtype),
        grid=(Np // tm, Np // tk),
        in_specs=in_specs,
        out_specs=pl.BlockSpec((tm, fout_p), lambda i, k: (i, 0)),
        scratch_shapes=[pltpu.VMEM((tm, facc), jnp.float32)],
        compiler_params=pltpu.CompilerParams(
            dimension_semantics=("parallel", "arbitrary"),
            vmem_limit_bytes=vmem_limit),
    )(*args)


# ----------------------------------------------------------------------------
# parameters (deterministic, matching GCN_arxiv_edge.__init__ / reset)
# ----------------------------------------------------------------------------
class GCNArxivEdgeParams:
    def __init__(self, key, in_channels, hidden_channels, out_channels,
                 num_layers):
        dims = ([in_channels] + [hidden_channels] * (num_layers - 1)
                + [out_channels])
        self.weights, self.biases = [], []
        self.bn_gamma, self.bn_beta, self.bn_mean, self.bn_var = [], [], [], []
        for i in range(num_layers):
            fin, fout = dims[i], dims[i + 1]
            key, wk = jax.random.split(key)
            bound = (6.0 / (fin + fout)) ** 0.5        # xavier_uniform_
            self.weights.append(
                jax.random.uniform(wk, (fin, fout), jnp.float32, -bound, bound))
            self.biases.append(jnp.zeros((1, fout), jnp.float32))
            if i < num_layers - 1:
                self.bn_gamma.append(jnp.ones((1, fout), jnp.float32))
                self.bn_beta.append(jnp.zeros((1, fout), jnp.float32))
                self.bn_mean.append(jnp.zeros((1, fout), jnp.float32))
                self.bn_var.append(jnp.ones((1, fout), jnp.float32))


# ----------------------------------------------------------------------------
# full forward (eval semantics)
# ----------------------------------------------------------------------------
def gcn_arxiv_edge_forward(params, A, x, eps=1e-5):
    N = A.shape[0]
    cfg = _tpu_config()
    tm, tk, Np = _choose_tiles(N, cfg["target_tm"], cfg["target_tk"])
    vmem_limit = cfg["vmem_limit"]

    # structural degrees (clamped at 1), norm='both' -> deg^{-1/2}
    binA = (A != 0).astype(jnp.float32)
    out_deg = jnp.maximum(jnp.sum(binA, axis=0), 1.0)   # per source node
    in_deg = jnp.maximum(jnp.sum(binA, axis=1), 1.0)    # per dest node
    dsrc = jnp.pad((out_deg ** -0.5).reshape(-1, 1), ((0, Np - N), (0, 0)))
    ddst = jnp.pad((in_deg ** -0.5).reshape(-1, 1), ((0, Np - N), (0, 0)))

    # 0/1 adjacency is exact in bf16; padded rows/cols are zero.
    A_bf16 = _pad2d(binA, Np, Np).astype(jnp.bfloat16)

    num_layers = len(params.weights)
    fin0_p = _round_up(x.shape[1], LANE)
    # invariant: h entering every layer is already scaled by dsrc (bf16).
    # (applied once here; subsequent layers get it from the fused epilogue)
    h = (_pad2d(x.astype(jnp.float32), Np, fin0_p) * dsrc).astype(jnp.bfloat16)

    for i in range(num_layers):
        W, b = params.weights[i], params.biases[i]
        fin, fout = W.shape
        fin_p, fout_p = _round_up(fin, LANE), _round_up(fout, LANE)
        last = (i == num_layers - 1)
        if not last:
            s = params.bn_gamma[i] / jnp.sqrt(params.bn_var[i] + eps)
            t = params.bn_beta[i] - params.bn_mean[i] * s
            Wf = W * s                              # fold BN scale into W
            shift = _pad2d(b * s + t, 1, fout_p)    # fused bias + BN shift
        else:
            Wf = W
            shift = _pad2d(b, 1, fout_p)
        Wp = _pad2d(Wf, fin_p, fout_p)
        h = gcn_layer_pallas(
            A_bf16, h, Wp, shift, dsrc, ddst,
            weight_first=(fin > fout),
            relu=not last,
            fold_dsrc=not last,
            out_dtype=jnp.float32 if last else jnp.bfloat16,
            tm=tm, tk=tk, vmem_limit=vmem_limit)
        # F.dropout(training=False) == identity
    return h[:N, :params.weights[-1].shape[1]]


# ----------------------------------------------------------------------------
# plain-JAX reference (eval-mode, f32)
# ----------------------------------------------------------------------------
def _reference_forward(params, A, x, eps=1e-5):
    hp = jax.lax.Precision.HIGHEST
    binA = (A != 0).astype(jnp.float32)
    out_deg = jnp.maximum(jnp.sum(binA, axis=0), 1.0)
    in_deg = jnp.maximum(jnp.sum(binA, axis=1), 1.0)
    dsrc = (out_deg ** -0.5).reshape(-1, 1)
    ddst = (in_deg ** -0.5).reshape(-1, 1)
    num_layers = len(params.weights)
    h = x
    for i in range(num_layers):
        W, b = params.weights[i], params.biases[i]
        fin, fout = W.shape
        hs = h * dsrc
        if fin > fout:
            r = jnp.dot(binA, jnp.dot(hs, W, precision=hp), precision=hp)
        else:
            r = jnp.dot(jnp.dot(binA, hs, precision=hp), W, precision=hp)
        r = r * ddst + b
        if i < num_layers - 1:
            s = params.bn_gamma[i] / jnp.sqrt(params.bn_var[i] + eps)
            t = params.bn_beta[i] - params.bn_mean[i] * s
            r = jnp.maximum(r * s + t, 0.0)
        h = r
    return h


if __name__ == "__main__":
    key = jax.random.PRNGKey(0)

    # small synthetic graph: N nodes, dense adjacency with self loops
    N = 512
    in_channels, hidden_channels, out_channels = 16, 32, 8
    num_layers = 3

    key, ka, kx, kp = jax.random.split(key, 4)
    A = (jax.random.uniform(ka, (N, N)) < 0.05).astype(jnp.float32)
    A = jnp.maximum(A, jnp.eye(N, dtype=jnp.float32))   # self loops
    x = jax.random.normal(kx, (N, in_channels), jnp.float32)

    params = GCNArxivEdgeParams(kp, in_channels, hidden_channels,
                                out_channels, num_layers)

    out = jax.block_until_ready(gcn_arxiv_edge_forward(params, A, x))
    ref = jax.block_until_ready(_reference_forward(params, A, x))

    assert out.shape == (N, out_channels)
    # bf16 feature path (A, xs, intermediate h) -> slightly looser tolerance
    assert bool(jnp.allclose(out, ref, atol=3e-2, rtol=3e-2)), (
        float(jnp.max(jnp.abs(out - ref))))

    print("KERNEL_OK")
</pallas_src>

<mosaic_0001>
module attributes {stable_mosaic.version = 11 : i64} {
  func.func @kernel(%arg0: i32, %arg1: i32, %arg2: memref<256x512xbf16, #tpu.memory_space<vmem>>, %arg3: memref<512x128xbf16, #tpu.memory_space<vmem>>, %arg4: memref<128x128xf32, #tpu.memory_space<vmem>>, %arg5: memref<256x1xf32, #tpu.memory_space<vmem>>, %arg6: memref<1x128xf32, #tpu.memory_space<vmem>>, %arg7: memref<256x1xf32, #tpu.memory_space<vmem>>, %arg8: memref<256x128xbf16, #tpu.memory_space<vmem>>, %arg9: memref<256x128xf32, #tpu.memory_space<vmem>>) attributes {dimension_semantics = [#tpu.dimension_semantics<parallel>, #tpu.dimension_semantics<arbitrary>], iteration_bounds = array<i64: 2, 1>, scalar_prefetch = 0 : i64, scratch_operands = 1 : i64, tpu.core_type = #tpu.core_type<tc>, window_params = [{transform_indices = @transform_0, window_bounds = array<i64: 256, 512>}, {transform_indices = @transform_1, window_bounds = array<i64: 512, 128>}, {pipeline_mode = #tpu.pipeline_mode<synchronous>, transform_indices = @transform_2, window_bounds = array<i64: 128, 128>}, {transform_indices = @transform_3, window_bounds = array<i64: 256, 1>}, {pipeline_mode = #tpu.pipeline_mode<synchronous>, transform_indices = @transform_4, window_bounds = array<i64: 1, 128>}, {transform_indices = @transform_5, window_bounds = array<i64: 256, 1>}, {transform_indices = @transform_6, window_bounds = array<i64: 256, 128>}]} {
    %c0_i32 = arith.constant 0 : i32
    %0 = arith.cmpi eq, %arg1, %c0_i32 : i32
    %1 = arith.extui %0 : i1 to i32
    %c0_i32_0 = arith.constant 0 : i32
    %2 = arith.cmpi ne, %1, %c0_i32_0 : i32
    scf.if %2 {
      %cst_10 = arith.constant 0.000000e+00 : f32
      %12 = vector.broadcast %cst_10 : f32 to vector<256x128xf32>
      %c0_11 = arith.constant 0 : index
      %c0_12 = arith.constant 0 : index
      %13 = vector.load %arg9[%c0_11, %c0_12] : memref<256x128xf32, #tpu.memory_space<vmem>>, vector<256x128xf32>
      tpu.vector_store %arg9[%c0_11, %c0_12], %12 {strides = array<i32>} : memref<256x128xf32, #tpu.memory_space<vmem>>, vector<256x128xf32>,
    } else {
    }
    %c0 = arith.constant 0 : index
    %c0_1 = arith.constant 0 : index
    %3 = vector.load %arg9[%c0, %c0_1] : memref<256x128xf32, #tpu.memory_space<vmem>>, vector<256x128xf32>
    %c0_2 = arith.constant 0 : index
    %c0_3 = arith.constant 0 : index
    %4 = vector.load %arg2[%c0_2, %c0_3] : memref<256x512xbf16, #tpu.memory_space<vmem>>, vector<256x512xbf16>
    %c0_4 = arith.constant 0 : index
    %c0_5 = arith.constant 0 : index
    %5 = vector.load %arg3[%c0_4, %c0_5] : memref<512x128xbf16, #tpu.memory_space<vmem>>, vector<512x128xbf16>
    %cst = arith.constant dense<0.000000e+00> : vector<256x128xf32>
    %6 = tpu.matmul %4, %5, %cst {dimension_numbers = #tpu.dot_dimension_numbers<[1], [0], [0], [1], [0, 0, 1, 1], [], []>} : vector<256x512xbf16>, vector<512x128xbf16>, vector<256x128xf32> -> vector<256x128xf32>
    %7 = arith.addf %3, %6 : vector<256x128xf32>
    %c0_6 = arith.constant 0 : index
    %c0_7 = arith.constant 0 : index
    %8 = vector.load %arg9[%c0_6, %c0_7] : memref<256x128xf32, #tpu.memory_space<vmem>>, vector<256x128xf32>
    tpu.vector_store %arg9[%c0_6, %c0_7], %7 {strides = array<i32>} : memref<256x128xf32, #tpu.memory_space<vmem>>, vector<256x128xf32>,
    %c0_i32_8 = arith.constant 0 : i32
    %9 = arith.cmpi eq, %arg1, %c0_i32_8 : i32
    %10 = arith.extui %9 : i1 to i32
    %c0_i32_9 = arith.constant 0 : i32
    %11 = arith.cmpi ne, %10, %c0_i32_9 : i32
    scf.if %11 {
      %c0_10 = arith.constant 0 : index
      %c0_11 = arith.constant 0 : index
      %12 = vector.load %arg9[%c0_10, %c0_11] : memref<256x128xf32, #tpu.memory_space<vmem>>, vector<256x128xf32>
      %c0_12 = arith.constant 0 : index
      %c0_13 = arith.constant 0 : index
      %13 = vector.load %arg4[%c0_12, %c0_13] : memref<128x128xf32, #tpu.memory_space<vmem>>, vector<128x128xf32>
      %cst_14 = arith.constant dense<0.000000e+00> : vector<256x128xf32>
      %14 = tpu.matmul %12, %13, %cst_14 {dimension_numbers = #tpu.dot_dimension_numbers<[1], [0], [0], [1], [0, 0, 1, 1], [], []>} : vector<256x128xf32>, vector<128x128xf32>, vector<256x128xf32> -> vector<256x128xf32>
      %c0_15 = arith.constant 0 : index
      %c0_16 = arith.constant 0 : index
      %15 = vector.load %arg5[%c0_15, %c0_16] : memref<256x1xf32, #tpu.memory_space<vmem>>, vector<256x1xf32>
      %16 = vector.broadcast %15 : vector<256x1xf32> to vector<256x128xf32>
      %17 = arith.mulf %14, %16 : vector<256x128xf32>
      %c0_17 = arith.constant 0 : index
      %c0_18 = arith.constant 0 : index
      %18 = vector.load %arg6[%c0_17, %c0_18] : memref<1x128xf32, #tpu.memory_space<vmem>>, vector<1x128xf32>
      %19 = vector.broadcast %18 : vector<1x128xf32> to vector<256x128xf32>
      %20 = arith.addf %17, %19 : vector<256x128xf32>
      %cst_19 = arith.constant 0.000000e+00 : f32
      %21 = vector.broadcast %cst_19 : f32 to vector<256x128xf32>
      %22 = arith.maximumf %20, %21 : vector<256x128xf32>
      %c0_20 = arith.constant 0 : index
      %c0_21 = arith.constant 0 : index
      %23 = vector.load %arg7[%c0_20, %c0_21] : memref<256x1xf32, #tpu.memory_space<vmem>>, vector<256x1xf32>
      %24 = vector.broadcast %23 : vector<256x1xf32> to vector<256x128xf32>
      %25 = arith.mulf %22, %24 : vector<256x128xf32>
      %26 = arith.truncf %25 : vector<256x128xf32> to vector<256x128xbf16>
      %c0_22 = arith.constant 0 : index
      %c0_23 = arith.constant 0 : index
      %27 = vector.load %arg8[%c0_22, %c0_23] : memref<256x128xbf16, #tpu.memory_space<vmem>>, vector<256x128xbf16>
      tpu.vector_store %arg8[%c0_22, %c0_23], %26 {strides = array<i32>} : memref<256x128xbf16, #tpu.memory_space<vmem>>, vector<256x128xbf16>,
    } else {
    }
    return
  }
  func.func @transform_0(%arg0: i32, %arg1: i32) -> (i32, i32) {
    %c0_i32 = arith.constant 0 : i32
    return %arg0, %arg1 : i32, i32
  }
  func.func @transform_1(%arg0: i32, %arg1: i32) -> (i32, i32) {
    %c0_i32 = arith.constant 0 : i32
    %c0_i32_0 = arith.constant 0 : i32
    return %arg1, %c0_i32 : i32, i32
  }
  func.func @transform_2(%arg0: i32, %arg1: i32) -> (i32, i32) {
    %c0_i32 = arith.constant 0 : i32
    %c0_i32_0 = arith.constant 0 : i32
    %c0_i32_1 = arith.constant 0 : i32
    return %c0_i32, %c0_i32_0 : i32, i32
  }
  func.func @transform_3(%arg0: i32, %arg1: i32) -> (i32, i32) {
    %c0_i32 = arith.constant 0 : i32
    %c0_i32_0 = arith.constant 0 : i32
    return %arg0, %c0_i32 : i32, i32
  }
  func.func @transform_4(%arg0: i32, %arg1: i32) -> (i32, i32) {
    %c0_i32 = arith.constant 0 : i32
    %c0_i32_0 = arith.constant 0 : i32
    %c0_i32_1 = arith.constant 0 : i32
    return %c0_i32, %c0_i32_0 : i32, i32
  }
  func.func @transform_5(%arg0: i32, %arg1: i32) -> (i32, i32) {
    %c0_i32 = arith.constant 0 : i32
    %c0_i32_0 = arith.constant 0 : i32
    return %arg0, %c0_i32 : i32, i32
  }
  func.func @transform_6(%arg0: i32, %arg1: i32) -> (i32, i32) {
    %c0_i32 = arith.constant 0 : i32
    %c0_i32_0 = arith.constant 0 : i32
    return %arg0, %c0_i32 : i32, i32
  }
}

</mosaic_0001>

<bundles_post_ra>
// kernel: tpu_custom_call.1
= control target key start
LH: loop header
LB: loop body
LE: loop exit
PB: predicated region body
PF: predicated region fallthrough
CT: control target
= control target key end

     0   :  { %11 = vsyncpa [#allocation4], 0  ;;  %s4136_s0 = inlined_call_operand.vmem [shape: bf16[512,512], index: 0, kind: input, shape index: {}]   ;;  %s4137_s1 = inlined_call_operand.hbm [shape: bf16[512,128], index: 1, kind: input, shape index: {}]   ;;  %s4138_s2 = inlined_call_operand.hbm [shape: f32[128,128], index: 2, kind: input, shape index: {}]   ;;  %s4139_s3 = inlined_call_operand.vmem [shape: f32[512,1], index: 3, kind: input, shape index: {}]   ;;  %s4140_s4 = inlined_call_operand.vmem [shape: f32[1,128], index: 4, kind: input, shape index: {}]   ;;  %s4141_s5 = inlined_call_operand.vmem [shape: f32[512,1], index: 5, kind: input, shape index: {}]   ;;  %s4142_s6 = inlined_call_operand.hbm [shape: bf16[512,128], index: 6, kind: output, shape index: {}]  }
   0x1   :  { %12 = vsyncpa [#allocation7], 0 }
   0x2   :  { %13 = vsyncpa [#allocation5], 0 }
   0x3   :  { %15 = vsyncpa [#allocation5 + $0x1], 0  ;;  %s3637_s21 = smov 0   ;;  %s3639_s22 = smov 0  }
   0x4   :  { %s3641_s23 = smov 0   ;;  %s3643_s24 = smov 0  }
   0x5   :  { %s3645_s25 = smov 0   ;;  %s3647_s26 = smov 0  }
   0x6 LB: > { %4149 = sst [smem:[#allocation12_spill]] %s3586_s25  ;;  %s2555_s27 = sadd.s32 4294967295, %s3590_s26   ;;  %s3590_s26 = sphi %s3647_s26, %s21_s26   ;;  %s3586_s25 = sphi %s3645_s25, %s4161_s25   ;;  %s3582_s24 = sphi %s3643_s24, %s4160_s24   ;;  %s3578_s23 = sphi %s3641_s23, %s4164_s23   ;;  %s3574_s22 = sphi %s3639_s22, %s4163_s22   ;;  %s3570_s21 = sphi %s3637_s21, %s4162_s21  }
   0x7   : > { %s2556_s28 = sadd.s32 4294967294, %s3590_s26   ;;  %s33_s29 = sadd.s32 1, %s3586_s25 }
   0x8   : > { %s188_s30 = sadd.s32 1, %s3578_s23  ;;  %p35_p0 = scmp.ge.s32.totalorder %s33_s29, 2 }
   0x9   : > { %p198_p1 = scmp.ne.s32.totalorder %s3578_s23, %s3574_s22  ;;  %p199_p2 = scmp.eq.s32.totalorder %s2555_s27, 1 }
   0xa   : > { %p204_p3 = scmp.ne.s32.totalorder %s3574_s22, %s3570_s21  ;;  %s4166_s29 = smov (%p35_p0, %s33_s29), 0 }
   0xb   : > { %4150 = sst [smem:[#allocation13_spill]] %s4166_s29  ;;  %p3677_p4 = por %p199_p2, %p198_p1 }
   0xc   : > { %p205_p5 = scmp.eq.s32.totalorder %s2556_s28, 1  ;;  %s185_s8 = ssub.s32 %s3586_s25, %s4166_s29 }
   0xd   : > { %s4151_s7 = scalar_select %p3677_p4, 1, 0 }
   0xe   : > { %p2557_p6 = scmp.ge.s32.totalorder %s3590_s26, 1  ;;  %p186_p7 = scmp.eq.s32.totalorder %s185_s8, 0 }
   0xf   : > { %p3684_p8 = por %p205_p5, %p204_p3  ;;  %p212_p9 = scmp.lt.s32.totalorder %s3590_s26, 3 }
  0x10   : > { %s3690_s10 = scalar_select %p186_p7, %s3578_s23, %s188_s30  }
  0x11   : > { %s4152_s9 = scalar_select %p3684_p8, 1, 0 }
  0x12   : > { %p3692_p10 = pnand %p2557_p6, %p212_p9  ;;  %p3696_p11 = scmp.eq.s32.totalorder %s2555_s27, 0 }
  0x13   : > { %s3592_s13 = smov [#allocation3]   ;;  %s3593_s16 = smov [#allocation6]  }
  0x14   : > { %s4153_s11 = scalar_select %p3692_p10, 1, 0 }
  0x15   : > { %s4154_s12 = scalar_select %p3696_p11, 1, 0 }
  0x16   : > { %p3245_p12 = pneg %p3692_p10  ;;  %s227_s14 = sshll.u32 %s3592_s13, 4  ;;  %s228_s14 = int_to_ptr.vmem [resolvable:$true] %s227_s14 }
  0x17   : > { %s240_s17 = sshll.u32 %s3593_s16, 4  ;;  %s3448_s20 = scalar_lea.hbm %s4137_s1, 4096  ;;  %s3708_s17 = int_to_ptr.vmem [resolvable:$true] %s240_s17 }
  0x18   : > { %p3704_p13 = pnand %p3696_p11, %p3245_p12  ;;  %p3449_p0 = scmp.ne.s32.totalorder %s4137_s1, %s3448_s20 }
  0x19   : > { %p3455_p5 = scmp.lt.u32.totalorder %s3448_s20, %s4137_s1 }
  0x1a   : > { %p3450_p1 = pneg %p3704_p13 }
  0x1c   : > { %p3451_p2 = pnand %p3450_p1, %p3449_p0 }
  0x1e   : > { %p3452_p3 = pneg %p3451_p2 }
  0x20   : > { %p3457_p6 = pnand %p3455_p5, %p3452_p3 }
  0x22   : > { %3460 = shalt.err (!%p3457_p6)
}
  0x23   : > { %s3461_s13 = scalar_lea.vmem %s228_s14, 4096  ;;  %p3469_p8 = scmp.lt.s32.totalorder %s228_s14, %s228_s14 }
  0x24   : > { %p3462_p7 = scmp.ne.s32.totalorder %s228_s14, %s3461_s13  ;;  %p3470_p4 = scmp.lt.s32.totalorder %s3461_s13, %s3461_s13 }
  0x26   : > { %p3464_p9 = pnand %p3462_p7, %p3450_p1  ;;  %p3471_p11 = por %p3470_p4, %p3469_p8 }
  0x28   : > { %p3465_p12 = pneg %p3464_p9 }
  0x2a   : > { %p3472_p10 = pnand %p3471_p11, %p3465_p12 }
  0x2c   : > { %3475 = shalt.err (!%p3472_p10)
}
  0x2d   : > { %s3594_s16 = smov 64   ;;  %s3595_s18 = smov 4  }
  0x2e   : > { %3248 = dma.hbm_to_vmem [thread:$0]  (!%p3704_p13), %s4137_s1, 4096, %s228_s14, [#allocation4], %s3594_s16, %s3594_s16, %s3595_s18  }
  0x2f   : > { %s3476_s30 = scalar_lea.hbm %s4138_s2, 2048 }
  0x30   : > { %p3477_p0 = scmp.ne.s32.totalorder %s4138_s2, %s3476_s30  ;;  %p3483_p10 = scmp.lt.u32.totalorder %s3476_s30, %s4138_s2 }
  0x32   : > { %p3479_p4 = pnand %p3477_p0, %p3450_p1 }
  0x34   : > { %p3480_p8 = pneg %p3479_p4 }
  0x36   : > { %p3485_p11 = pnand %p3483_p10, %p3480_p8 }
  0x38   : > { %3488 = shalt.err (!%p3485_p11)
}
  0x39   : > { %s3489_s14 = scalar_lea.vmem %s3708_s17, 2048  ;;  %p3497_p6 = scmp.lt.s32.totalorder %s3708_s17, %s3708_s17 }
  0x3a   : > { %p3490_p2 = scmp.ne.s32.totalorder %s3708_s17, %s3489_s14  ;;  %p3498_p7 = scmp.lt.s32.totalorder %s3489_s14, %s3489_s14 }
  0x3c   : > { %p3492_p3 = pnand %p3490_p2, %p3450_p1  ;;  %p3499_p9 = por %p3498_p7, %p3497_p6 }
  0x3e   : > { %p3493_p5 = pneg %p3492_p3 }
  0x40   : > { %p3500_p12 = pnand %p3499_p9, %p3493_p5 }
  0x42   : > { %3503 = shalt.err (!%p3500_p12)
}
  0x43   : > { %s3596_s25 = smov 128   ;;  %s3597_s29 = smov 8  }
  0x44   : > { %3251 = dma.hbm_to_vmem [thread:$0]  (!%p3704_p13), %s4138_s2, 2048, %s3708_s17, [#allocation7], %s3596_s25, %s3596_s25, %s3597_s29  }
  0x45   : > { %p4156_p0 = scmp.ne.s32.totalorder %s4153_s11, 0 }
  0x46   : > { %p4157_p1 = scmp.ne.s32.totalorder (!%p4156_p0), %s4154_s12, 0 }
  0x47   : > { %292 = sbr.rel (%p4156_p0) target bundleno = 723 (0x2d3), region = 44 }
  0x4e   : > { %3557 = dma.done.wait (%p4157_p1), [#allocation4], 4096  }
  0x4f   : > { %3559 = vsyncadd (%p4157_p1), [#allocation4], 4294963200 }
  0x50   : > { %3561 = dma.done.wait (%p4157_p1), [#allocation7], 2048  }
  0x51   : > { %3563 = vsyncadd (%p4157_p1), [#allocation7], 4294965248  ;;  %v3320_v0 = vld [vmem:[#allocation3 + $0x40] sm:$0xff]   ;;  %s2565_s15 = sshll.u32 %s3582_s24, 5  ;;  %v3322_v2 = vld [vmem:[#allocation3 + $0x48] sm:$0xff]   ;;  %s338_s16 = sand.u32 1, %s3574_s22  }
  0x52   : > { %v3321_v1 = vld [vmem:[#allocation3] sm:$0xff]   ;;  %3219 = vmatprep.subr.bf16.mxu1 %v3320_v0  ;;  %2835 = vmatprep.subr.bf16.mxu0 %v3320_v0  ;;  %v3323_v3 = vld [vmem:[#allocation3 + $0x8] sm:$0xff]   ;;  %p343_p13 = scmp.lt.s32.totalorder %s2565_s15, 63  ;;  %v3324_v4 = vld [vmem:[#allocation3 + $0x50] sm:$0xff]   ;;  %s2564_s18 = sshll.u32 %s338_s16, 7 }
  0x53   : > { %3227 = vmatpush3.bf16.msra.mxu1 %v3321_v1  ;;  %2836 = vmatpush3.bf16.msra.mxu0 %v3321_v1  ;;  %v3325_v5 = vld [vmem:[#allocation3 + $0x10] sm:$0xff]   ;;  %v3326_v6 = vld [vmem:[#allocation3 + $0x58] sm:$0xff]   ;;  %v3328_v8 = vld [vmem:[#allocation3 + $0x60] sm:$0xff]   ;;  %s4090_s27 = scalar_lea.sflag [#allocation5], %s338_s16  ;;  %p4158_p8 = scmp.ne.s32.totalorder %s4151_s7, 0 }
  0x54   : > { %3220 = vmatprep.subr.bf16.mxu1 %v3322_v2  ;;  %2837 = vmatprep.subr.bf16.mxu0 %v3322_v2  ;;  %s4168_s15 = smov (!%p343_p13, %s2565_s15), 63  ;;  %v3327_v7 = vld [vmem:[#allocation3 + $0x18] sm:$0xff]   ;;  %v3329_v9 = vld [vmem:[#allocation3 + $0x20] sm:$0xff]   ;;  %v3330_v10 = vld [vmem:[#allocation3 + $0x68] sm:$0xff]   ;;  %s3599_s28 = smov [#allocation8]  }
  0x55   : > { %s2706_s11 = sshll.u32 %s4168_s15, 4  ;;  %v3331_v12 = vld [vmem:[#allocation3 + $0x28] sm:$0xff]   ;;  %v3332_v13 = vld [vmem:[#allocation3 + $0x70] sm:$0xff]   ;;  %v3334_v15 = vld [vmem:[#allocation3 + $0x78] sm:$0xff]   ;;  %s2569_s20 = sshll.u32 %s4168_s15, 3 }
  0x56   : > { %s3774_s19 = scalar_lea.vmem %s4136_s0, %s2706_s11  ;;  %v3333_v14 = vld [vmem:[#allocation3 + $0x30] sm:$0xff]   ;;  %v3335_v16 = vld [vmem:[#allocation3 + $0x38] sm:$0xff]   ;;  %v3339_v17 = vld [vmem:[#allocation3 + $0xc0] sm:$0xff]   ;;  %s3829_s30 = scalar_lea.vmem %s4139_s3, %s2569_s20 }
  0x57   : > { %3228 = vmatpush3.bf16.msra.mxu1 %v3323_v3  ;;  %2838 = vmatpush3.bf16.msra.mxu0 %v3323_v3  ;;  %v3338_v11 = vld [vmem:[%s3774_s19 + $0x184] ss:$16 sps:$4 sm:$0xff]   ;;  %v3336_v18 = vld [vmem:[%s3774_s19 + $0x180] ss:$16 sps:$4 sm:$0xff]   ;;  %v3341_v21 = vld [vmem:[#allocation3 + $0xc8] sm:$0xff]   ;;  %s3885_s14 = scalar_lea.vmem %s4141_s5, %s2569_s20  ;;  %s4006_s15 = scalar_lea.vmem [#allocation8], %s2564_s18 }
  0x58   : > { %3221 = vmatprep.subr.bf16.mxu1 %v3324_v4  ;;  %2839 = vmatprep.subr.bf16.mxu0 %v3324_v4  ;;  %v3340_v19 = vld [vmem:[#allocation3 + $0x80] sm:$0xff]   ;;  %v3342_v22 = vld [vmem:[#allocation3 + $0x88] sm:$0xff]   ;;  %v3346_v24 = vld [vmem:[#allocation3 + $0xd0] sm:$0xff]   ;;  %s2739_s11 = sshll.u32 %s3582_s24, 11  ;;  %s2431_s12 = sshll.u32 %s4006_s15, 4  ;;  %s4085_s12 = int_to_ptr.vmem [resolvable:$true] %s2431_s12 }
  0x59   : > { %1204 = vmatprep.mubr.bf16.mxu1 %v3338_v11  ;;  %v3343_v20 = vld [vmem:[%s3774_s19 + $0x1a4] ss:$16 sps:$4 sm:$0xff]   ;;  %v3345_v23 = vld [vmem:[%s3774_s19 + $0x1a0] ss:$16 sps:$4 sm:$0xff]   ;;  %v3348_v28 = vld [vmem:[#allocation3 + $0xd8] sm:$0xff]   ;;  %s4083_s20 = scalar_lea.hbm %s4142_s6, %s2739_s11  ;;  %s3504_s24 = scalar_lea.vmem %s4085_s12, 2048 }
  0x5a   : > { %v3347_v25 = vld [vmem:[#allocation3 + $0x90] sm:$0xff]   ;;  %v3349_v31 = vld [vmem:[#allocation3 + $0x98] sm:$0xff]   ;;  %v3353_v33 = vld [vmem:[#allocation3 + $0xe0] sm:$0xff]   ;;  %p3505_p4 = scmp.ne.s32.totalorder %s4085_s12, %s3504_s24 }
  0x5b   : > { %3229 = vmatpush3.bf16.msra.mxu1 %v3325_v5  ;;  %2840 = vmatpush3.bf16.msra.mxu0 %v3325_v5  ;;  %v3364_v26 = vld [vmem:[%s3774_s19] ss:$16 sps:$4 sm:$0xff]   ;;  %v3366_v27 = vld [vmem:[%s3774_s19 + $0x4] ss:$16 sps:$4 sm:$0xff]   ;;  %v3355_v38 = vld [vmem:[#allocation3 + $0xe8] sm:$0xff]  }
  0x5c   : > { %3222 = vmatprep.subr.bf16.mxu1 %v3326_v6  ;;  %2841 = vmatprep.subr.bf16.mxu0 %v3326_v6  ;;  %v3350_v29 = vld [vmem:[%s3774_s19 + $0x1c4] ss:$16 sps:$4 sm:$0xff]   ;;  %v3352_v32 = vld [vmem:[%s3774_s19 + $0x1c0] ss:$16 sps:$4 sm:$0xff]   ;;  %v3356_v39 = vld [vmem:[#allocation3 + $0xa8] sm:$0xff]   ;;  %p3506_p10 = pnand %p3505_p4, %p4158_p8 }
  0x5d   : > { %1108 = vmatprep.mubr.bf16.mxu0 %v3366_v27  ;;  %v3370_v30 = vld [vmem:[%s3774_s19 + $0x24] ss:$16 sps:$4 sm:$0xff]   ;;  %v3374_v34 = vld [vmem:[%s3774_s19 + $0x20] ss:$16 sps:$4 sm:$0xff]   ;;  %v3369_v45 = vld [vmem:[%s3774_s19 + $0xc] ss:$16 sps:$4 sm:$0xff]  }
  0x5e   : > { %v3376_v35 = vld [vmem:[%s3774_s19 + $0x44] ss:$16 sps:$4 sm:$0xff]   ;;  %v3359_v40 = vld [vmem:[%s3774_s19 + $0x1e0] ss:$16 sps:$4 sm:$0xff]   ;;  %v3362_v46 = vld [vmem:[#allocation3 + $0xf8] sm:$0xff]   ;;  %p3507_p11 = pneg %p3506_p10 }
  0x5f   : > { %3230 = vmatpush3.bf16.msra.mxu1 %v3327_v7  ;;  %2842 = vmatpush3.bf16.msra.mxu0 %v3327_v7  ;;  %v3354_v36 = vld [vmem:[#allocation3 + $0xa0] sm:$0xff]   ;;  %v3360_v41 = vld [vmem:[#allocation3 + $0xf0] sm:$0xff]   ;;  %v3363_v47 = vld [vmem:[#allocation3 + $0xb8] sm:$0xff]  }
  0x60   : > { %3223 = vmatprep.subr.bf16.mxu1 %v3328_v8  ;;  %2843 = vmatprep.subr.bf16.mxu0 %v3328_v8  ;;  %v3357_v37 = vld [vmem:[%s3774_s19 + $0x1e4] ss:$16 sps:$4 sm:$0xff]   ;;  %v3380_v42 = vld [vmem:[%s3774_s19 + $0x40] ss:$16 sps:$4 sm:$0xff]   ;;  %v3367_v48 = vld [vmem:[%s3774_s19 + $0x8] ss:$16 sps:$4 sm:$0xff]  }
  0x61   : > { %v3382_v43 = vld [vmem:[%s3774_s19 + $0x64] ss:$16 sps:$4 sm:$0xff]   ;;  %v3386_v49 = vld [vmem:[%s3774_s19 + $0x60] ss:$16 sps:$4 sm:$0xff]   ;;  %v3372_v51 = vld [vmem:[%s3774_s19 + $0x2c] ss:$16 sps:$4 sm:$0xff]  }
  0x62   : > { %v3361_v44 = vld [vmem:[#allocation3 + $0xb0] sm:$0xff]   ;;  %v3375_v53 = vld [vmem:[%s3774_s19 + $0x28] ss:$16 sps:$4 sm:$0xff]   ;;  %v3378_v55 = vld [vmem:[%s3774_s19 + $0x4c] ss:$16 sps:$4 sm:$0xff]  }
  0x63   : > { %3231 = vmatpush3.bf16.msra.mxu1 %v3329_v9  ;;  %2844 = vmatpush3.bf16.msra.mxu0 %v3329_v9  ;;  %v3388_v50 = vld [vmem:[%s3774_s19 + $0x84] ss:$16 sps:$4 sm:$0xff]   ;;  %v3392_v52 = vld [vmem:[%s3774_s19 + $0x80] ss:$16 sps:$4 sm:$0xff]   ;;  %v3381_v57 = vld [vmem:[%s3774_s19 + $0x48] ss:$16 sps:$4 sm:$0xff]  }
  0x64   : > { %3224 = vmatprep.subr.bf16.mxu1 %v3330_v10  ;;  %2845 = vmatprep.subr.bf16.mxu0 %v3330_v10  ;;  %v3394_v54 = vld [vmem:[%s3774_s19 + $0xa4] ss:$16 sps:$4 sm:$0xff]   ;;  %v3398_v56 = vld [vmem:[%s3774_s19 + $0xa0] ss:$16 sps:$4 sm:$0xff]   ;;  %v3384_v59 = vld [vmem:[%s3774_s19 + $0x6c] ss:$16 sps:$4 sm:$0xff]  }
  0x65   : > { %v3400_v58 = vld [vmem:[%s3774_s19 + $0xc4] ss:$16 sps:$4 sm:$0xff]   ;;  %v3404_v60 = vld [vmem:[%s3774_s19 + $0xc0] ss:$16 sps:$4 sm:$0xff]   ;;  %v3387_v61 = vld [vmem:[%s3774_s19 + $0x68] ss:$16 sps:$4 sm:$0xff]  }
  0x66   : > { %v3406_v62 = vld [vmem:[%s3774_s19 + $0xe4] ss:$16 sps:$4 sm:$0xff]   ;;  %v3390_v63 = vld [vmem:[%s3774_s19 + $0x8c] ss:$16 sps:$4 sm:$0xff]   ;;  %v3410_v0 = vld [vmem:[%s3774_s19 + $0xe0] ss:$16 sps:$4 sm:$0xff]  }
  0x67   : > { %3232 = vmatpush3.bf16.msra.mxu1 %v3331_v12  ;;  %2846 = vmatpush3.bf16.msra.mxu0 %v3331_v12  ;;  %v3393_v1 = vld [vmem:[%s3774_s19 + $0x88] ss:$16 sps:$4 sm:$0xff]   ;;  %v3412_v2 = vld [vmem:[%s3774_s19 + $0x104] ss:$16 sps:$4 sm:$0xff]   ;;  %v3396_v3 = vld [vmem:[%s3774_s19 + $0xac] ss:$16 sps:$4 sm:$0xff]  }
  0x68   : > { %3225 = vmatprep.subr.bf16.mxu1 %v3332_v13  ;;  %2847 = vmatprep.subr.bf16.mxu0 %v3332_v13  ;;  %v3416_v4 = vld [vmem:[%s3774_s19 + $0x100] ss:$16 sps:$4 sm:$0xff]   ;;  %v3399_v5 = vld [vmem:[%s3774_s19 + $0xa8] ss:$16 sps:$4 sm:$0xff]   ;;  %v3418_v6 = vld [vmem:[%s3774_s19 + $0x124] ss:$16 sps:$4 sm:$0xff]  }
  0x69   : > { %v3402_v7 = vld [vmem:[%s3774_s19 + $0xcc] ss:$16 sps:$4 sm:$0xff]   ;;  %v3422_v8 = vld [vmem:[%s3774_s19 + $0x120] ss:$16 sps:$4 sm:$0xff]   ;;  %v3405_v9 = vld [vmem:[%s3774_s19 + $0xc8] ss:$16 sps:$4 sm:$0xff]  }
  0x6a   : > { %v3424_v10 = vld [vmem:[%s3774_s19 + $0x144] ss:$16 sps:$4 sm:$0xff]   ;;  %v3408_v11 = vld [vmem:[%s3774_s19 + $0xec] ss:$16 sps:$4 sm:$0xff]   ;;  %v3428_v12 = vld [vmem:[%s3774_s19 + $0x140] ss:$16 sps:$4 sm:$0xff]  }
  0x6b   : > { %3233 = vmatpush3.bf16.msra.mxu1 %v3333_v14  ;;  %2848 = vmatpush3.bf16.msra.mxu0 %v3333_v14  ;;  %v3411_v13 = vld [vmem:[%s3774_s19 + $0xe8] ss:$16 sps:$4 sm:$0xff]   ;;  %v3430_v14 = vld [vmem:[%s3774_s19 + $0x164] ss:$16 sps:$4 sm:$0xff]  }
  0x6c   : > { %3226 = vmatprep.subr.bf16.mxu1 %v3334_v15  ;;  %2849 = vmatprep.subr.bf16.mxu0 %v3334_v15  ;;  %v3414_v15 = vld [vmem:[%s3774_s19 + $0x10c] ss:$16 sps:$4 sm:$0xff]  }
  0x6d   : > { %v1500_v27 = vld [vmem:[#allocation6 + $0x18] sm:$0xff] }
  0x6f   : > { %3234 = vmatpush3.bf16.msra.mxu1 %v3335_v16  ;;  %2850 = vmatpush3.bf16.msra.mxu0 %v3335_v16  ;;  %v3598_v16 = vmov 0  }
  0x70   : > { %2947 = vmatprep.subr.bf16.mxu1 %v3339_v17  ;;  %3319 = vset.pattern.permute.xlu1 %v3598_v16  ;;  %v1740_v17 = vld [vmem:[%s3829_s30 + $0x10] sm:$0xff] }
  0x71   : > { %3318 = vset.pattern.permute.xlu0 %v3598_v16  ;;  %1782 = vperm.xlu1 %3319, %v1740_v17   ;;  %v1765_v16 = vld [vmem:[%s3829_s30 + $0xd8] sm:$0xff]  ;;  %v1764_v17 = vld [vmem:[%s3829_s30 + $0xd0] sm:$0xff] }
  0x72   : > { %1205 = vmatmul.mubr.bf16.vlgmr.msra.gmra.mrb[0].mxu1 %v3336_v18  ;;  %1109 = vmatmul.mubr.bf16.vlgmr.msra.gmra.mrb[0].mxu0 %v3364_v26  ;;  %v1738_v18 = vld [vmem:[%s3829_s30] sm:$0xff]  ;;  %v1499_v26 = vld [vmem:[#allocation6 + $0x10] sm:$0xff] }
  0x73   : > { %2948 = vmatpush3.bf16.msra.mxu1 %v3340_v19  ;;  %1212 = vmatprep.mubr.bf16.mxu1 %v3343_v20  ;;  %v1497_v19 = vld [vmem:[#allocation6] sm:$0xff]  ;;  %v1498_v20 = vld [vmem:[#allocation6 + $0x8] sm:$0xff] }
  0x74   : > { %2949 = vmatprep.subr.bf16.mxu1 %v3341_v21  ;;  %1116 = vmatprep.mubr.bf16.mxu0 %v3370_v30  ;;  %v1741_v21 = vld [vmem:[%s3829_s30 + $0x18] sm:$0xff]  ;;  %v1742_v30 = vld [vmem:[%s3829_s30 + $0x20] sm:$0xff] }
  0x75   : > { %1772 = vperm.xlu0 %3318, %v1738_v18   ;;  %1787 = vperm.xlu1 %3319, %v1741_v21   ;;  %v3444_v18 = vld [vmem:[%s3774_s19 + $0x1c8] ss:$16 sps:$4 sm:$0xff]   ;;  %v1766_v21 = vld [vmem:[%s3829_s30 + $0xe0] sm:$0xff] }
  0x77   : > { %2950 = vmatpush3.bf16.msra.mxu1 %v3342_v22  ;;  %v3187_v22 = vpack.c.bf16 %v1498_v20, %v1497_v19  ;;  %v3445_v19 = vld [vmem:[%s3774_s19 + $0x1ec] ss:$16 sps:$4 sm:$0xff]  }
  0x78   : > { %2951 = vmatprep.subr.bf16.mxu1 %v3346_v24  ;;  %v3434_v24 = vld [vmem:[%s3774_s19 + $0x160] ss:$16 sps:$4 sm:$0xff]   ;;  %v1767_v20 = vld [vmem:[%s3829_s30 + $0xe8] sm:$0xff] }
  0x79   : > { %3188 = vmatprep.subr.bf16.mxu0 %v3187_v22 }
  0x7a   : > { %1213 = vmatmul.mubr.bf16.gmra.mrb[4].mxu1 %v3345_v23  ;;  %1117 = vmatmul.mubr.bf16.gmra.mrb[4].mxu0 %v3374_v34  ;;  %v1739_v23 = vld [vmem:[%s3829_s30 + $0x8] sm:$0xff]  ;;  %v1501_v34 = vld [vmem:[#allocation6 + $0x20] sm:$0xff] }
  0x7b   : > { %2952 = vmatpush3.bf16.msra.mxu1 %v3347_v25  ;;  %1220 = vmatprep.mubr.bf16.mxu1 %v3350_v29  ;;  %v3417_v25 = vld [vmem:[%s3774_s19 + $0x108] ss:$16 sps:$4 sm:$0xff]  }
  0x7c   : > { %2953 = vmatprep.subr.bf16.mxu1 %v3348_v28  ;;  %1124 = vmatprep.mubr.bf16.mxu0 %v3376_v35  ;;  %v3420_v28 = vld [vmem:[%s3774_s19 + $0x12c] ss:$16 sps:$4 sm:$0xff]  }
  0x7d   : > { %3190 = vmatpush3.bf16.msra.mxu0 %v3187_v22  ;;  %1777 = vperm.xlu0 %3318, %v1739_v23   ;;  %v1743_v29 = vld [vmem:[%s3829_s30 + $0x28] sm:$0xff]  ;;  %v1769_v22 = vld [vmem:[%s3829_s30 + $0xf8] sm:$0xff]  ;;  %v1768_v23 = vld [vmem:[%s3829_s30 + $0xf0] sm:$0xff] }
  0x7e   : > { %1797 = vperm.xlu1 %3319, %v1743_v29   ;;  %v1502_v35 = vld [vmem:[#allocation6 + $0x28] sm:$0xff] }
  0x7f   : > { %2954 = vmatpush3.bf16.msra.mxu1 %v3349_v31  ;;  %v3191_v31 = vpack.c.bf16 %v1500_v27, %v1499_v26  ;;  %v2033_v26 = vld [vmem:[%s3885_s14] sm:$0xff]  ;;  %v2036_v27 = vld [vmem:[%s3885_s14 + $0x18] sm:$0xff]  ;;  %v2038_v29 = vld [vmem:[%s3885_s14 + $0x28] sm:$0xff] }
  0x80   : > { %2955 = vmatprep.subr.bf16.mxu1 %v3353_v33  ;;  %v1744_v33 = vld [vmem:[%s3829_s30 + $0x30] sm:$0xff] }
  0x81   : > { %1792 = vperm.xlu0 %3318, %v1742_v30   ;;  %3192 = vmatprep.subr.bf16.mxu0 %v3191_v31  ;;  %v2037_v30 = vld [vmem:[%s3885_s14 + $0x20] sm:$0xff] }
  0x82   : > { %1221 = vmatmul.mubr.bf16.gmra.mrb[8].mxu1 %v3352_v32  ;;  %1125 = vmatmul.mubr.bf16.gmra.mrb[8].mxu0 %v3380_v42  ;;  %v1745_v32 = vld [vmem:[%s3829_s30 + $0x38] sm:$0xff]  ;;  %v1746_v42 = vld [vmem:[%s3829_s30 + $0x40] sm:$0xff] }
  0x83   : > { %2956 = vmatpush3.bf16.msra.mxu1 %v3354_v36  ;;  %1228 = vmatprep.mubr.bf16.mxu1 %v3357_v37  ;;  %v3195_v36 = vpack.c.bf16 %v1502_v35, %v1501_v34  ;;  %v3423_v37 = vld [vmem:[%s3774_s19 + $0x128] ss:$16 sps:$4 sm:$0xff]   ;;  %v2041_v34 = vld [vmem:[%s3885_s14 + $0x40] sm:$0xff] }
  0x84   : > { %2957 = vmatprep.subr.bf16.mxu1 %v3355_v38  ;;  %1132 = vmatprep.mubr.bf16.mxu0 %v3382_v43  ;;  %v1503_v38 = vld [vmem:[#allocation6 + $0x30] sm:$0xff]  ;;  %v2044_v35 = vld [vmem:[%s3885_s14 + $0x58] sm:$0xff] }
  0x85   : > { %3194 = vmatpush3.bf16.msra.mxu0 %v3191_v31  ;;  %1807 = vperm.xlu1 %3319, %v1745_v32   ;;  %v2040_v31 = vld [vmem:[%s3885_s14 + $0x38] sm:$0xff]  ;;  %v2039_v32 = vld [vmem:[%s3885_s14 + $0x30] sm:$0xff] }
  0x86   : > { %1802 = vperm.xlu0 %3318, %v1744_v33   ;;  %3196 = vmatprep.subr.bf16.mxu0 %v3195_v36  ;;  %v2042_v33 = vld [vmem:[%s3885_s14 + $0x48] sm:$0xff] }
  0x87   : > { %2958 = vmatpush3.bf16.msra.mxu1 %v3356_v39  ;;  %v1504_v39 = vld [vmem:[#allocation6 + $0x38] sm:$0xff] }
  0x88   : > { %2959 = vmatprep.subr.bf16.mxu1 %v3360_v41  ;;  %v1747_v41 = vld [vmem:[%s3829_s30 + $0x48] sm:$0xff]  ;;  %v3199_v43 = vpack.c.bf16 %v1504_v39, %v1503_v38  ;;  %v2045_v38 = vld [vmem:[%s3885_s14 + $0x60] sm:$0xff]  ;;  %v2048_v39 = vld [vmem:[%s3885_s14 + $0x78] sm:$0xff] }
  0x89   : > { %3198 = vmatpush3.bf16.msra.mxu0 %v3195_v36  ;;  %1817 = vperm.xlu1 %3319, %v1747_v41   ;;  %v2043_v36 = vld [vmem:[%s3885_s14 + $0x50] sm:$0xff]  ;;  %v2050_v41 = vld [vmem:[%s3885_s14 + $0x88] sm:$0xff] }
  0x8a   : > { %1229 = vmatmul.mubr.bf16.gmra.mrb[12].mxu1 %v3359_v40  ;;  %1133 = vmatmul.mubr.bf16.gmra.mrb[12].mxu0 %v3386_v49  ;;  %v3426_v40 = vld [vmem:[%s3774_s19 + $0x14c] ss:$16 sps:$4 sm:$0xff]   ;;  %v3429_v49 = vld [vmem:[%s3774_s19 + $0x148] ss:$16 sps:$4 sm:$0xff]  }
  0x8b   : > { %2960 = vmatpush3.bf16.msra.mxu1 %v3361_v44  ;;  %1269 = vmatprep.mubr.bf16.mxu1 %v3369_v45  ;;  %v1749_v44 = vld [vmem:[%s3829_s30 + $0x58] sm:$0xff]  ;;  %v1748_v45 = vld [vmem:[%s3829_s30 + $0x50] sm:$0xff] }
  0x8c   : > { %2961 = vmatprep.subr.bf16.mxu1 %v3362_v46  ;;  %1140 = vmatprep.mubr.bf16.mxu0 %v3388_v50  ;;  %v1505_v46 = vld [vmem:[#allocation6 + $0x40] sm:$0xff]  ;;  %v1507_v50 = vld [vmem:[#allocation6 + $0x50] sm:$0xff] }
  0x8d   : > { %1812 = vperm.xlu0 %3318, %v1746_v42   ;;  %3200 = vmatprep.subr.bf16.mxu0 %v3199_v43  ;;  %v2049_v42 = vld [vmem:[%s3885_s14 + $0x80] sm:$0xff] }
  0x8e   : > { %3202 = vmatpush3.bf16.msra.mxu0 %v3199_v43  ;;  %1827 = vperm.xlu1 %3319, %v1749_v44   ;;  %v2052_v43 = vld [vmem:[%s3885_s14 + $0x98] sm:$0xff]  ;;  %v2051_v44 = vld [vmem:[%s3885_s14 + $0x90] sm:$0xff] }
  0x8f   : > { %2962 = vmatpush3.bf16.msra.mxu1 %v3363_v47  ;;  %v1506_v47 = vld [vmem:[#allocation6 + $0x48] sm:$0xff] }
  0x91   : > { %1822 = vperm.xlu0 %3318, %v1748_v45   ;;  %v2054_v45 = vld [vmem:[%s3885_s14 + $0xa8] sm:$0xff] }
  0x92   : > { %1270 = vmatmul.mubr.bf16.vlgmr.msra.gmra.mrb[16].mxu1 %v3367_v48  ;;  %1141 = vmatmul.mubr.bf16.gmra.mrb[16].mxu0 %v3392_v52  ;;  %v3203_v48 = vpack.c.bf16 %v1506_v47, %v1505_v46  ;;  %v3432_v52 = vld [vmem:[%s3774_s19 + $0x16c] ss:$16 sps:$4 sm:$0xff]   ;;  %v2053_v46 = vld [vmem:[%s3885_s14 + $0xa0] sm:$0xff] }
  0x93   : > { %1277 = vmatprep.mubr.bf16.mxu1 %v3372_v51  ;;  %1148 = vmatprep.mubr.bf16.mxu0 %v3394_v54  ;;  %v1508_v51 = vld [vmem:[#allocation6 + $0x58] sm:$0xff]  ;;  %v1750_v54 = vld [vmem:[%s3829_s30 + $0x60] sm:$0xff] }
  0x94   : > { %3204 = vmatprep.subr.bf16.mxu0 %v3203_v48  ;;  %v2056_v47 = vld [vmem:[%s3885_s14 + $0xb8] sm:$0xff] }
  0x95   : > { %3206 = vmatpush3.bf16.msra.mxu0 %v3203_v48  ;;  %1832 = vperm.xlu0 %3318, %v1750_v54   ;;  %v2055_v48 = vld [vmem:[%s3885_s14 + $0xb0] sm:$0xff]  ;;  %v2061_v54 = vld [vmem:[%s3885_s14 + $0xe0] sm:$0xff] }
  0x9a   : > { %1278 = vmatmul.mubr.bf16.gmra.mrb[20].mxu1 %v3375_v53  ;;  %1149 = vmatmul.mubr.bf16.gmra.mrb[20].mxu0 %v3398_v56  ;;  %v1751_v53 = vld [vmem:[%s3829_s30 + $0x68] sm:$0xff]  ;;  %v1753_v56 = vld [vmem:[%s3829_s30 + $0x78] sm:$0xff] }
  0x9b   : > { %1285 = vmatprep.mubr.bf16.mxu1 %v3378_v55  ;;  %1156 = vmatprep.mubr.bf16.mxu0 %v3400_v58  ;;  %v3207_v55 = vpack.c.bf16 %v1508_v51, %v1507_v50  ;;  %v1509_v58 = vld [vmem:[#allocation6 + $0x60] sm:$0xff]  ;;  %v2060_v51 = vld [vmem:[%s3885_s14 + $0xd8] sm:$0xff] }
  0x9c   : > { %1837 = vperm.xlu1 %3319, %v1751_v53   ;;  %v2057_v50 = vld [vmem:[%s3885_s14 + $0xc0] sm:$0xff]  ;;  %v2062_v53 = vld [vmem:[%s3885_s14 + $0xe8] sm:$0xff] }
  0x9d   : > { %3208 = vmatprep.subr.bf16.mxu0 %v3207_v55 }
  0x9e   : > { %3210 = vmatpush3.bf16.msra.mxu0 %v3207_v55  ;;  %v2064_v55 = vld [vmem:[%s3885_s14 + $0xf8] sm:$0xff] }
  0xa0   : > { %1847 = vperm.xlu1 %3319, %v1753_v56   ;;  %v2063_v56 = vld [vmem:[%s3885_s14 + $0xf0] sm:$0xff] }
  0xa2   : > { %1286 = vmatmul.mubr.bf16.gmra.mrb[24].mxu1 %v3381_v57  ;;  %1157 = vmatmul.mubr.bf16.gmra.mrb[24].mxu0 %v3404_v60  ;;  %v1752_v57 = vld [vmem:[%s3829_s30 + $0x70] sm:$0xff] }
  0xa3   : > { %1293 = vmatprep.mubr.bf16.mxu1 %v3384_v59  ;;  %1164 = vmatprep.mubr.bf16.mxu0 %v3406_v62  ;;  %v1510_v59 = vld [vmem:[#allocation6 + $0x68] sm:$0xff]  ;;  %v1511_v62 = vld [vmem:[#allocation6 + $0x70] sm:$0xff] }
  0xa4   : > { %v3211_v60 = vpack.c.bf16 %v1510_v59, %v1509_v58  ;;  %1842 = vperm.xlu0 %3318, %v1752_v57  }
  0xa6   : > { %3212 = vmatprep.subr.bf16.mxu0 %v3211_v60 }
  0xa7   : > { %3214 = vmatpush3.bf16.msra.mxu0 %v3211_v60 }
  0xaa   : > { %1294 = vmatmul.mubr.bf16.gmra.mrb[28].mxu1 %v3387_v61  ;;  %1165 = vmatmul.mubr.bf16.gmra.mrb[28].mxu0 %v3410_v0  ;;  %v3435_v61 = vld [vmem:[%s3774_s19 + $0x168] ss:$16 sps:$4 sm:$0xff]   ;;  %v3436_v0 = vld [vmem:[%s3774_s19 + $0x18c] ss:$16 sps:$4 sm:$0xff]  }
  0xab   : > { %1301 = vmatprep.mubr.bf16.mxu1 %v3390_v63  ;;  %1172 = vmatprep.mubr.bf16.mxu0 %v3412_v2  ;;  %v1512_v63 = vld [vmem:[#allocation6 + $0x78] sm:$0xff]  ;;  %v1754_v2 = vld [vmem:[%s3829_s30 + $0x80] sm:$0xff] }
  0xac   : > { %1852 = vperm.xlu0 %3318, %v1754_v2  }
  0xb2   : > { %1302 = vmatmul.mubr.bf16.gmra.mrb[32].mxu1 %v3393_v1  ;;  %1173 = vmatmul.mubr.bf16.gmra.mrb[32].mxu0 %v3416_v4  ;;  %v1755_v1 = vld [vmem:[%s3829_s30 + $0x88] sm:$0xff]  ;;  %v1757_v4 = vld [vmem:[%s3829_s30 + $0x98] sm:$0xff] }
  0xb3   : > { %1309 = vmatprep.mubr.bf16.mxu1 %v3396_v3  ;;  %1180 = vmatprep.mubr.bf16.mxu0 %v3418_v6  ;;  %v3215_v3 = vpack.c.bf16 %v1512_v63, %v1511_v62  ;;  %v3438_v6 = vld [vmem:[%s3774_s19 + $0x188] ss:$16 sps:$4 sm:$0xff]  }
  0xb4   : > { %1857 = vperm.xlu1 %3319, %v1755_v1  }
  0xb5   : > { %3216 = vmatprep.subr.bf16.mxu0 %v3215_v3 }
  0xb6   : > { %3218 = vmatpush3.bf16.msra.mxu0 %v3215_v3 }
  0xb8   : > { %1867 = vperm.xlu1 %3319, %v1757_v4  }
  0xba   : > { %1310 = vmatmul.mubr.bf16.gmra.mrb[36].mxu1 %v3399_v5  ;;  %1181 = vmatmul.mubr.bf16.gmra.mrb[36].mxu0 %v3422_v8  ;;  %v1756_v5 = vld [vmem:[%s3829_s30 + $0x90] sm:$0xff]  ;;  %v1759_v8 = vld [vmem:[%s3829_s30 + $0xa8] sm:$0xff] }
  0xbb   : > { %1317 = vmatprep.mubr.bf16.mxu1 %v3402_v7  ;;  %1188 = vmatprep.mubr.bf16.mxu0 %v3424_v10  ;;  %v3439_v7 = vld [vmem:[%s3774_s19 + $0x1ac] ss:$16 sps:$4 sm:$0xff]  }
  0xbc   : > { %1862 = vperm.xlu0 %3318, %v1756_v5   ;;  %1877 = vperm.xlu1 %3319, %v1759_v8   ;;  %v1761_v10 = vld [vmem:[%s3829_s30 + $0xb8] sm:$0xff] }
  0xc0   : > { %1887 = vperm.xlu1 %3319, %v1761_v10  }
  0xc2   : > { %1318 = vmatmul.mubr.bf16.gmra.mrb[40].mxu1 %v3405_v9  ;;  %1189 = vmatmul.mubr.bf16.gmra.mrb[40].mxu0 %v3428_v12  ;;  %v1758_v9 = vld [vmem:[%s3829_s30 + $0xa0] sm:$0xff]  ;;  %v3441_v12 = vld [vmem:[%s3774_s19 + $0x1a8] ss:$16 sps:$4 sm:$0xff]  }
  0xc3   : > { %1325 = vmatprep.mubr.bf16.mxu1 %v3408_v11  ;;  %1196 = vmatprep.mubr.bf16.mxu0 %v3430_v14  ;;  %v1760_v11 = vld [vmem:[%s3829_s30 + $0xb0] sm:$0xff]  ;;  %v1763_v14 = vld [vmem:[%s3829_s30 + $0xc8] sm:$0xff] }
  0xc4   : > { %1872 = vperm.xlu0 %3318, %v1758_v9   ;;  %1897 = vperm.xlu1 %3319, %v1763_v14  }
  0xc8   : > { %1882 = vperm.xlu0 %3318, %v1760_v11   ;;  %1907 = vperm.xlu1 %3319, %v1765_v16  }
  0xca   : > { %1326 = vmatmul.mubr.bf16.gmra.mrb[44].mxu1 %v3411_v13  ;;  %1197 = vmatmul.mubr.bf16.gmra.mrb[44].mxu0 %v3434_v24  ;;  %v3442_v13 = vld [vmem:[%s3774_s19 + $0x1cc] ss:$16 sps:$4 sm:$0xff]   ;;  %v3447_v24 = vld [vmem:[%s3774_s19 + $0x1e8] ss:$16 sps:$4 sm:$0xff]  }
  0xcb   : > { %1333 = vmatprep.mubr.bf16.mxu1 %v3414_v15  ;;  %v1762_v15 = vld [vmem:[%s3829_s30 + $0xc0] sm:$0xff]  ;;  %s3508_s30 = sshll.u32 %s3599_s28, 4  ;;  %s3509_s30 = int_to_ptr.vmem [resolvable:$false] %s3508_s30 }
  0xcc   : > { %1892 = vperm.xlu0 %3318, %v1762_v15   ;;  %1917 = vperm.xlu1 %3319, %v1767_v20   ;;  %s3510_s8 = scalar_lea.vmem %s3509_s30, 4096  ;;  %p3511_p2 = scmp.lt.s32.totalorder %s4085_s12, %s3509_s30 }
  0xcd   : > { %p3512_p3 = scmp.lt.s32.totalorder %s3510_s8, %s3504_s24 }
  0xcf   : > { %p3513_p5 = por %p3512_p3, %p3511_p2 }
  0xd0   : > { %1902 = vperm.xlu0 %3318, %v1764_v17   ;;  %1927 = vperm.xlu1 %3319, %v1769_v22  }
  0xd1   : > { %p3514_p6 = pnand %p3513_p5, %p3507_p11 }
  0xd2   : > { %1334 = vmatmul.mubr.bf16.gmra.mrb[48].mxu1 %v3417_v25  ;;  %v2034_v25 = vld [vmem:[%s3885_s14 + $0x8] sm:$0xff] }
  0xd3   : > { %1341 = vmatprep.mubr.bf16.mxu1 %v3420_v28  ;;  %v2035_v28 = vld [vmem:[%s3885_s14 + $0x10] sm:$0xff] }
  0xd4   : > { %1912 = vperm.xlu0 %3318, %v1766_v21   ;;  %2072 = vperm.xlu1 %3319, %v2034_v25  }
  0xd8   : > { %1922 = vperm.xlu0 %3318, %v1768_v23   ;;  %2082 = vperm.xlu1 %3319, %v2036_v27  }
  0xda   : > { %1342 = vmatmul.mubr.bf16.gmra.mrb[52].mxu1 %v3423_v37  ;;  %v2046_v37 = vld [vmem:[%s3885_s14 + $0x68] sm:$0xff] }
  0xdb   : > { %1349 = vmatprep.mubr.bf16.mxu1 %v3426_v40  ;;  %v2047_v40 = vld [vmem:[%s3885_s14 + $0x70] sm:$0xff] }
  0xdc   : > { %2067 = vperm.xlu0 %3318, %v2033_v26   ;;  %2092 = vperm.xlu1 %3319, %v2038_v29  }
  0xe0   : > { %2077 = vperm.xlu0 %3318, %v2035_v28   ;;  %2102 = vperm.xlu1 %3319, %v2040_v31  }
  0xe2   : > { %1350 = vmatmul.mubr.bf16.gmra.mrb[56].mxu1 %v3429_v49  ;;  %v2058_v49 = vld [vmem:[%s3885_s14 + $0xc8] sm:$0xff] }
  0xe3   : > { %1357 = vmatprep.mubr.bf16.mxu1 %v3432_v52  ;;  %v2059_v52 = vld [vmem:[%s3885_s14 + $0xd0] sm:$0xff] }
  0xe4   : > { %2087 = vperm.xlu0 %3318, %v2037_v30   ;;  %2112 = vperm.xlu1 %3319, %v2042_v33  }
  0xe8   : > { %2097 = vperm.xlu0 %3318, %v2039_v32   ;;  %2122 = vperm.xlu1 %3319, %v2044_v35  }
  0xea   : > { %1358 = vmatmul.mubr.bf16.gmra.mrb[60].mxu1 %v3435_v61 }
  0xeb   : > { %1365 = vmatprep.mubr.bf16.mxu1 %v3436_v0 }
  0xec   : > { %2107 = vperm.xlu0 %3318, %v2041_v34   ;;  %2132 = vperm.xlu1 %3319, %v2046_v37  }
  0xf0   : > { %2117 = vperm.xlu0 %3318, %v2043_v36   ;;  %2142 = vperm.xlu1 %3319, %v2048_v39  }
  0xf2   : > { %1366 = vmatmul.mubr.bf16.gmra.mrb[64].mxu1 %v3438_v6 }
  0xf3   : > { %1373 = vmatprep.mubr.bf16.mxu1 %v3439_v7 }
  0xf4   : > { %2127 = vperm.xlu0 %3318, %v2045_v38   ;;  %2152 = vperm.xlu1 %3319, %v2050_v41  }
  0xf8   : > { %2137 = vperm.xlu0 %3318, %v2047_v40   ;;  %2162 = vperm.xlu1 %3319, %v2052_v43  }
  0xfa   : > { %1374 = vmatmul.mubr.bf16.gmra.mrb[68].mxu1 %v3441_v12 }
  0xfb   : > { %1381 = vmatprep.mubr.bf16.mxu1 %v3442_v13 }
  0xfc   : > { %2147 = vperm.xlu0 %3318, %v2049_v42   ;;  %2172 = vperm.xlu1 %3319, %v2054_v45  }
 0x100   : > { %2157 = vperm.xlu0 %3318, %v2051_v44   ;;  %2182 = vperm.xlu1 %3319, %v2056_v47  }
 0x102   : > { %1382 = vmatmul.mubr.bf16.gmra.mrb[72].mxu1 %v3444_v18 }
 0x103   : > { %1389 = vmatprep.mubr.bf16.mxu1 %v3445_v19 }
 0x104   : > { %2167 = vperm.xlu0 %3318, %v2053_v46   ;;  %2192 = vperm.xlu1 %3319, %v2058_v49  }
 0x108   : > { %2177 = vperm.xlu0 %3318, %v2055_v48   ;;  %2202 = vperm.xlu1 %3319, %v2060_v51  }
 0x10a   : > { %1390 = vmatmul.mubr.bf16.gmra.mrb[76].mxu1 %v3447_v24 }
 0x10c   : > { %2187 = vperm.xlu0 %3318, %v2057_v50   ;;  %2212 = vperm.xlu1 %3319, %v2062_v53  }
 0x110   : > { %2197 = vperm.xlu0 %3318, %v2059_v52   ;;  %2222 = vperm.xlu1 %3319, %v2064_v55  }
 0x114   : > { %2207 = vperm.xlu0 %3318, %v2061_v54  }
 0x118   : > { %2217 = vperm.xlu0 %3318, %v2063_v56  }
 0x145   : > { %v2923_v57 = vpop.f32.mrb[0].mxu1  ;;  %v2851_v63 = vpop.f32.mrb[0].mxu0 }
 0x146   : > { %v2924_v58 = vpop.f32.mrb[1].mxu1  ;;  %v2852_v1 = vpop.f32.mrb[1].mxu0 }
 0x147   : > { %v3919_v59 = vadd.f32 %v2924_v58, %v2923_v57  ;;  %v2926_v60 = vpop.f32.mrb[2].mxu1  ;;  %v2853_v3 = vadd.f32 %v2852_v1, %v2851_v63  ;;  %v2854_v4 = vpop.f32.mrb[2].mxu0 }
 0x148   : > { %v2927_v61 = vpop.f32.mrb[3].mxu1  ;;  %v2855_v7 = vpop.f32.mrb[3].mxu0 }
 0x149   : > { %v3921_v62 = vadd.f32 %v2927_v61, %v2926_v60  ;;  %v2856_v9 = vadd.f32 %v2855_v7, %v2854_v4 }
 0x14d   : > { %v2929_v0 = vpop.f32.mrb[4].mxu1  ;;  %v2857_v11 = vpop.f32.mrb[4].mxu0 }
 0x14e   : > { %v2930_v2 = vpop.f32.mrb[5].mxu1  ;;  %v2858_v13 = vpop.f32.mrb[5].mxu0 }
 0x14f   : > { %v3923_v5 = vadd.f32 %v2930_v2, %v2929_v0  ;;  %v2932_v6 = vpop.f32.mrb[6].mxu1  ;;  %v2859_v15 = vadd.f32 %v2858_v13, %v2857_v11  ;;  %v2860_v16 = vpop.f32.mrb[6].mxu0 }
 0x150   : > { %v2933_v8 = vpop.f32.mrb[7].mxu1  ;;  %v2861_v19 = vpop.f32.mrb[7].mxu0 }
 0x151   : > { %v3925_v10 = vadd.f32 %v2933_v8, %v2932_v6  ;;  %v2862_v21 = vadd.f32 %v2861_v19, %v2860_v16 }
 0x155   : > { %v2935_v12 = vpop.f32.mrb[8].mxu1  ;;  %v2863_v23 = vpop.f32.mrb[8].mxu0 }
 0x156   : > { %v2936_v14 = vpop.f32.mrb[9].mxu1  ;;  %v2864_v25 = vpop.f32.mrb[9].mxu0 }
 0x157   : > { %v3927_v17 = vadd.f32 %v2936_v14, %v2935_v12  ;;  %v2938_v18 = vpop.f32.mrb[10].mxu1  ;;  %v2865_v27 = vadd.f32 %v2864_v25, %v2863_v23  ;;  %v2866_v28 = vpop.f32.mrb[10].mxu0 }
 0x158   : > { %v2939_v20 = vpop.f32.mrb[11].mxu1  ;;  %v2867_v31 = vpop.f32.mrb[11].mxu0 }
 0x159   : > { %v3929_v22 = vadd.f32 %v2939_v20, %v2938_v18  ;;  %v2868_v33 = vadd.f32 %v2867_v31, %v2866_v28 }
 0x15d   : > { %v2941_v24 = vpop.f32.mrb[12].mxu1  ;;  %v2869_v35 = vpop.f32.mrb[12].mxu0 }
 0x15e   : > { %v2942_v26 = vpop.f32.mrb[13].mxu1  ;;  %v2870_v37 = vpop.f32.mrb[13].mxu0 }
 0x15f   : > { %v3931_v29 = vadd.f32 %v2942_v26, %v2941_v24  ;;  %v2944_v30 = vpop.f32.mrb[14].mxu1  ;;  %v2871_v39 = vadd.f32 %v2870_v37, %v2869_v35  ;;  %v2872_v40 = vpop.f32.mrb[14].mxu0 }
 0x160   : > { %v2945_v32 = vpop.f32.mrb[15].mxu1  ;;  %v2873_v43 = vpop.f32.mrb[15].mxu0 }
 0x161   : > { %v3933_v34 = vadd.f32 %v2945_v32, %v2944_v30  ;;  %v2874_v45 = vadd.f32 %v2873_v43, %v2872_v40 }
 0x165   : > { %v2963_v36 = vpop.f32.mrb[16].mxu1  ;;  %v2875_v49 = vpop.f32.mrb[16].mxu0 }
 0x166   : > { %v2964_v38 = vpop.f32.mrb[17].mxu1  ;;  %v2876_v51 = vpop.f32.mrb[17].mxu0 }
 0x167   : > { %v2965_v41 = vadd.f32 %v2964_v38, %v2963_v36  ;;  %v2966_v42 = vpop.f32.mrb[18].mxu1  ;;  %v2877_v53 = vadd.f32 %v2876_v51, %v2875_v49  ;;  %v2878_v54 = vpop.f32.mrb[18].mxu0 }
 0x168   : > { %v2967_v44 = vpop.f32.mrb[19].mxu1  ;;  %v2879_v57 = vpop.f32.mrb[19].mxu0 }
 0x169   : > { %v1272_v46 = vadd.f32 %v2965_v41, %v2853_v3  ;;  %v2968_v47 = vadd.f32 %v2967_v44, %v2966_v42  ;;  %v2880_v60 = vadd.f32 %v2879_v57, %v2878_v54 }
 0x16b   : > { %v1275_v48 = vadd.f32 %v2968_v47, %v2856_v9  ;;  %3139 = vmatprep.mubr.f32.mxu0 %v1272_v46 }
 0x16d   : > { %v2969_v50 = vpop.f32.mrb[20].mxu1  ;;  %3140 = vmatmul.mubr.f32.vlgmr.msra.gmra.mrb[48].mxu0 %v1275_v48  ;;  %v2881_v1 = vpop.f32.mrb[20].mxu0 }
 0x16e   : > { %v2970_v52 = vpop.f32.mrb[21].mxu1  ;;  %v2882_v3 = vpop.f32.mrb[21].mxu0 }
 0x16f   : > { %v2971_v55 = vadd.f32 %v2970_v52, %v2969_v50  ;;  %v2972_v56 = vpop.f32.mrb[22].mxu1  ;;  %v2883_v6 = vadd.f32 %v2882_v3, %v2881_v1  ;;  %v2884_v7 = vpop.f32.mrb[22].mxu0 }
 0x170   : > { %v2973_v58 = vpop.f32.mrb[23].mxu1  ;;  %v2885_v11 = vpop.f32.mrb[23].mxu0 }
 0x171   : > { %v1280_v61 = vadd.f32 %v2971_v55, %v2859_v15  ;;  %v2974_v63 = vadd.f32 %v2973_v58, %v2972_v56  ;;  %v2886_v13 = vadd.f32 %v2885_v11, %v2884_v7 }
 0x173   : > { %v1283_v0 = vadd.f32 %v2974_v63, %v2862_v21  ;;  %3142 = vmatprep.mubr.f32.mxu0 %v1280_v61 }
 0x175   : > { %v2975_v2 = vpop.f32.mrb[24].mxu1  ;;  %3143 = vmatmul.mubr.f32.gmra.mrb[50].mxu0 %v1283_v0  ;;  %v2887_v15 = vpop.f32.mrb[24].mxu0 }
 0x176   : > { %v2976_v4 = vpop.f32.mrb[25].mxu1  ;;  %v2888_v20 = vpop.f32.mrb[25].mxu0 }
 0x177   : > { %v2977_v8 = vadd.f32 %v2976_v4, %v2975_v2  ;;  %v2978_v9 = vpop.f32.mrb[26].mxu1  ;;  %v2889_v23 = vadd.f32 %v2888_v20, %v2887_v15  ;;  %v2890_v24 = vpop.f32.mrb[26].mxu0 }
 0x178   : > { %v2979_v12 = vpop.f32.mrb[27].mxu1  ;;  %v2891_v28 = vpop.f32.mrb[27].mxu0 }
 0x179   : > { %v1288_v14 = vadd.f32 %v2977_v8, %v2865_v27  ;;  %v2980_v16 = vadd.f32 %v2979_v12, %v2978_v9  ;;  %v2892_v31 = vadd.f32 %v2891_v28, %v2890_v24 }
 0x17b   : > { %v1291_v18 = vadd.f32 %v2980_v16, %v2868_v33  ;;  %3145 = vmatprep.mubr.f32.mxu0 %v1288_v14 }
 0x17d   : > { %v2981_v19 = vpop.f32.mrb[28].mxu1  ;;  %3146 = vmatmul.mubr.f32.gmra.mrb[52].mxu0 %v1291_v18  ;;  %v2893_v27 = vpop.f32.mrb[28].mxu0 }
 0x17e   : > { %v2982_v21 = vpop.f32.mrb[29].mxu1  ;;  %v2894_v33 = vpop.f32.mrb[29].mxu0 }
 0x17f   : > { %v2983_v25 = vadd.f32 %v2982_v21, %v2981_v19  ;;  %v2984_v26 = vpop.f32.mrb[30].mxu1  ;;  %v2895_v40 = vadd.f32 %v2894_v33, %v2893_v27  ;;  %v2896_v41 = vpop.f32.mrb[30].mxu0 }
 0x180   : > { %v2985_v30 = vpop.f32.mrb[31].mxu1  ;;  %v2897_v44 = vpop.f32.mrb[31].mxu0 }
 0x181   : > { %v1296_v32 = vadd.f32 %v2983_v25, %v2871_v39  ;;  %v2986_v35 = vadd.f32 %v2985_v30, %v2984_v26  ;;  %v2898_v47 = vadd.f32 %v2897_v44, %v2896_v41 }
 0x183   : > { %v1299_v36 = vadd.f32 %v2986_v35, %v2874_v45  ;;  %3148 = vmatprep.mubr.f32.mxu0 %v1296_v32 }
 0x185   : > { %v2987_v37 = vpop.f32.mrb[32].mxu1  ;;  %3149 = vmatmul.mubr.f32.gmra.mrb[54].mxu0 %v1299_v36  ;;  %v2899_v39 = vpop.f32.mrb[32].mxu0 }
 0x186   : > { %v2988_v38 = vpop.f32.mrb[33].mxu1  ;;  %v2900_v45 = vpop.f32.mrb[33].mxu0 }
 0x187   : > { %v2989_v42 = vadd.f32 %v2988_v38, %v2987_v37  ;;  %v2990_v43 = vpop.f32.mrb[34].mxu1  ;;  %v2901_v54 = vadd.f32 %v2900_v45, %v2899_v39  ;;  %v2902_v55 = vpop.f32.mrb[34].mxu0 }
 0x188   : > { %v2991_v46 = vpop.f32.mrb[35].mxu1  ;;  %v2903_v58 = vpop.f32.mrb[35].mxu0 }
 0x189   : > { %v1304_v48 = vadd.f32 %v2989_v42, %v2877_v53  ;;  %v2992_v49 = vadd.f32 %v2991_v46, %v2990_v43  ;;  %v2904_v63 = vadd.f32 %v2903_v58, %v2902_v55 }
 0x18b   : > { %v1307_v50 = vadd.f32 %v2992_v49, %v2880_v60  ;;  %3151 = vmatprep.mubr.f32.mxu0 %v1304_v48 }
 0x18d   : > { %v2993_v51 = vpop.f32.mrb[36].mxu1  ;;  %3152 = vmatmul.mubr.f32.gmra.mrb[56].mxu0 %v1307_v50  ;;  %v2905_v53 = vpop.f32.mrb[36].mxu0 }
 0x18e   : > { %v2994_v52 = vpop.f32.mrb[37].mxu1  ;;  %v2906_v60 = vpop.f32.mrb[37].mxu0 }
 0x18f   : > { %v2995_v56 = vadd.f32 %v2994_v52, %v2993_v51  ;;  %v2996_v57 = vpop.f32.mrb[38].mxu1  ;;  %v2907_v7 = vadd.f32 %v2906_v60, %v2905_v53  ;;  %v2908_v8 = vpop.f32.mrb[38].mxu0 }
 0x190   : > { %v2997_v61 = vpop.f32.mrb[39].mxu1  ;;  %v2909_v12 = vpop.f32.mrb[39].mxu0 }
 0x191   : > { %v1312_v0 = vadd.f32 %v2995_v56, %v2883_v6  ;;  %v2998_v1 = vadd.f32 %v2997_v61, %v2996_v57  ;;  %v2910_v16 = vadd.f32 %v2909_v12, %v2908_v8 }
 0x193   : > { %v1315_v2 = vadd.f32 %v2998_v1, %v2886_v13  ;;  %3154 = vmatprep.mubr.f32.mxu0 %v1312_v0 }
 0x195   : > { %v2999_v3 = vpop.f32.mrb[40].mxu1  ;;  %3155 = vmatmul.mubr.f32.gmra.mrb[58].mxu0 %v1315_v2  ;;  %v2911_v6 = vpop.f32.mrb[40].mxu0 }
 0x196   : > { %v3000_v4 = vpop.f32.mrb[41].mxu1  ;;  %v2912_v13 = vpop.f32.mrb[41].mxu0 }
 0x197   : > { %v3001_v9 = vadd.f32 %v3000_v4, %v2999_v3  ;;  %v3002_v11 = vpop.f32.mrb[42].mxu1  ;;  %v2913_v24 = vadd.f32 %v2912_v13, %v2911_v6  ;;  %v2914_v25 = vpop.f32.mrb[42].mxu0 }
 0x198   : > { %v3003_v14 = vpop.f32.mrb[43].mxu1  ;;  %v2915_v30 = vpop.f32.mrb[43].mxu0 }
 0x199   : > { %v1320_v18 = vadd.f32 %v3001_v9, %v2889_v23  ;;  %v3004_v15 = vadd.f32 %v3003_v14, %v3002_v11  ;;  %v2916_v35 = vadd.f32 %v2915_v30, %v2914_v25 }
 0x19b   : > { %v1323_v19 = vadd.f32 %v3004_v15, %v2892_v31  ;;  %3157 = vmatprep.mubr.f32.mxu0 %v1320_v18 }
 0x19d   : > { %v3005_v20 = vpop.f32.mrb[44].mxu1  ;;  %3158 = vmatmul.mubr.f32.gmra.mrb[60].mxu0 %v1323_v19  ;;  %v2917_v23 = vpop.f32.mrb[44].mxu0 }
 0x19e   : > { %v3006_v21 = vpop.f32.mrb[45].mxu1  ;;  %v2918_v31 = vpop.f32.mrb[45].mxu0 }
 0x19f   : > { %v3007_v26 = vadd.f32 %v3006_v21, %v3005_v20  ;;  %v3008_v28 = vpop.f32.mrb[46].mxu1  ;;  %v2919_v41 = vadd.f32 %v2918_v31, %v2917_v23  ;;  %v2920_v42 = vpop.f32.mrb[46].mxu0 }
 0x1a0   : > { %v3009_v32 = vpop.f32.mrb[47].mxu1  ;;  %v2921_v46 = vpop.f32.mrb[47].mxu0 }
 0x1a1   : > { %v1328_v36 = vadd.f32 %v3007_v26, %v2895_v40  ;;  %v3010_v27 = vadd.f32 %v3009_v32, %v3008_v28  ;;  %v2922_v49 = vadd.f32 %v2921_v46, %v2920_v42 }
 0x1a3   : > { %v1331_v37 = vadd.f32 %v3010_v27, %v2898_v47  ;;  %3160 = vmatprep.mubr.f32.mxu0 %v1328_v36 }
 0x1a5   : > { %v3011_v33 = vpop.f32.mrb[48].mxu1  ;;  %3161 = vmatmul.mubr.f32.gmra.mrb[62].mxu0 %v1331_v37 }
 0x1a6   : > { %v3012_v38 = vpop.f32.mrb[49].mxu1 }
 0x1a7   : > { %v3013_v43 = vadd.f32 %v3012_v38, %v3011_v33  ;;  %v3014_v44 = vpop.f32.mrb[50].mxu1 }
 0x1a8   : > { %v3015_v48 = vpop.f32.mrb[51].mxu1 }
 0x1a9   : > { %v1336_v50 = vadd.f32 %v3013_v43, %v2901_v54  ;;  %v3016_v39 = vadd.f32 %v3015_v48, %v3014_v44 }
 0x1ab   : > { %v1339_v51 = vadd.f32 %v3016_v39, %v2904_v63  ;;  %3163 = vmatprep.mubr.f32.mxu0 %v1336_v50  ;;  %v1773_v50 = vpop.permute.xlu0 %1772 }
 0x1ad   : > { %v3017_v40 = vpop.f32.mrb[52].mxu1  ;;  %3164 = vmatmul.mubr.f32.gmra.mrb[64].mxu0 %v1339_v51 }
 0x1ae   : > { %v3018_v47 = vpop.f32.mrb[53].mxu1 }
 0x1af   : > { %v3019_v45 = vadd.f32 %v3018_v47, %v3017_v40  ;;  %v3020_v52 = vpop.f32.mrb[54].mxu1  ;;  %v1778_v39 = vpop.permute.xlu0 %1777 }
 0x1b0   : > { %v3021_v55 = vpop.f32.mrb[55].mxu1 }
 0x1b1   : > { %v1344_v56 = vadd.f32 %v3019_v45, %v2907_v7  ;;  %v3022_v57 = vadd.f32 %v3021_v55, %v3020_v52 }
 0x1b3   : > { %v1347_v58 = vadd.f32 %v3022_v57, %v2910_v16  ;;  %3166 = vmatprep.mubr.f32.mxu0 %v1344_v56 }
 0x1b5   : > { %v3023_v61 = vpop.f32.mrb[56].mxu1  ;;  %3167 = vmatmul.mubr.f32.gmra.mrb[66].mxu0 %v1347_v58 }
 0x1b6   : > { %v3024_v0 = vpop.f32.mrb[57].mxu1 }
 0x1b7   : > { %v3025_v1 = vadd.f32 %v3024_v0, %v3023_v61  ;;  %v3026_v2 = vpop.f32.mrb[58].mxu1 }
 0x1b8   : > { %v3027_v53 = vpop.f32.mrb[59].mxu1 }
 0x1b9   : > { %v1352_v54 = vadd.f32 %v3025_v1, %v2913_v24  ;;  %v3028_v3 = vadd.f32 %v3027_v53, %v3026_v2 }
 0x1bb   : > { %v1355_v63 = vadd.f32 %v3028_v3, %v2916_v35  ;;  %3169 = vmatprep.mubr.f32.mxu0 %v1352_v54 }
 0x1bd   : > { %v3029_v60 = vpop.f32.mrb[60].mxu1  ;;  %3170 = vmatmul.mubr.f32.gmra.mrb[68].mxu0 %v1355_v63 }
 0x1be   : > { %v3030_v4 = vpop.f32.mrb[61].mxu1 }
 0x1bf   : > { %v3031_v8 = vadd.f32 %v3030_v4, %v3029_v60  ;;  %v3032_v9 = vpop.f32.mrb[62].mxu1 }
 0x1c0   : > { %v3033_v11 = vpop.f32.mrb[63].mxu1 }
 0x1c1   : > { %v1360_v7 = vadd.f32 %v3031_v8, %v2919_v41  ;;  %v3034_v12 = vadd.f32 %v3033_v11, %v3032_v9 }
 0x1c3   : > { %v1363_v14 = vadd.f32 %v3034_v12, %v2922_v49  ;;  %3172 = vmatprep.mubr.f32.mxu0 %v1360_v7  ;;  %v1783_v49 = vpop.permute.xlu1 %1782 }
 0x1c5   : > { %v3035_v16 = vpop.f32.mrb[64].mxu1  ;;  %3173 = vmatmul.mubr.f32.gmra.mrb[70].mxu0 %v1363_v14 }
 0x1c6   : > { %v3036_v18 = vpop.f32.mrb[65].mxu1 }
 0x1c7   : > { %v3037_v15 = vadd.f32 %v3036_v18, %v3035_v16  ;;  %v3038_v19 = vpop.f32.mrb[66].mxu1  ;;  %v3996_v16 = vld [vmem:[%s4140_s4] ss:$0 sm:$0xff] }
 0x1c8   : > { %v3039_v6 = vpop.f32.mrb[67].mxu1 }
 0x1c9   : > { %v1368_v20 = vadd.f32 %v3037_v15, %v3919_v59  ;;  %v3040_v13 = vadd.f32 %v3039_v6, %v3038_v19 }
 0x1cb   : > { %v1371_v21 = vadd.f32 %v3040_v13, %v3921_v62  ;;  %3175 = vmatprep.mubr.f32.mxu0 %v1368_v20 }
 0x1cd   : > { %v3041_v24 = vpop.f32.mrb[68].mxu1  ;;  %3176 = vmatmul.mubr.f32.gmra.mrb[72].mxu0 %v1371_v21 }
 0x1ce   : > { %v3042_v25 = vpop.f32.mrb[69].mxu1 }
 0x1cf   : > { %v3043_v26 = vadd.f32 %v3042_v25, %v3041_v24  ;;  %v3044_v28 = vpop.f32.mrb[70].mxu1 }
 0x1d0   : > { %v3045_v30 = vpop.f32.mrb[71].mxu1 }
 0x1d1   : > { %v1376_v32 = vadd.f32 %v3043_v26, %v3923_v5  ;;  %v3046_v35 = vadd.f32 %v3045_v30, %v3044_v28 }
 0x1d3   : > { %v1379_v36 = vadd.f32 %v3046_v35, %v3925_v10  ;;  %3178 = vmatprep.mubr.f32.mxu0 %v1376_v32 }
 0x1d5   : > { %v3047_v27 = vpop.f32.mrb[72].mxu1  ;;  %3179 = vmatmul.mubr.f32.gmra.mrb[74].mxu0 %v1379_v36 }
 0x1d6   : > { %v3048_v37 = vpop.f32.mrb[73].mxu1 }
 0x1d7   : > { %v3049_v59 = vadd.f32 %v3048_v37, %v3047_v27  ;;  %v3050_v23 = vpop.f32.mrb[74].mxu1 }
 0x1d8   : > { %v3051_v33 = vpop.f32.mrb[75].mxu1 }
 0x1d9   : > { %v1384_v62 = vadd.f32 %v3049_v59, %v3927_v17  ;;  %v3052_v31 = vadd.f32 %v3051_v33, %v3050_v23  ;;  %v1788_v17 = vpop.permute.xlu1 %1787 }
 0x1db   : > { %v1387_v38 = vadd.f32 %v3052_v31, %v3929_v22  ;;  %3181 = vmatprep.mubr.f32.mxu0 %v1384_v62  ;;  %v1793_v22 = vpop.permute.xlu0 %1792 }
 0x1dd   : > { %v3053_v41 = vpop.f32.mrb[76].mxu1  ;;  %3182 = vmatmul.mubr.f32.gmra.mrb[76].mxu0 %v1387_v38  ;;  %v1798_v51 = vpop.permute.xlu1 %1797 }
 0x1de   : > { %v3054_v42 = vpop.f32.mrb[77].mxu1 }
 0x1df   : > { %v3055_v5 = vadd.f32 %v3054_v42, %v3053_v41  ;;  %v3056_v43 = vpop.f32.mrb[78].mxu1  ;;  %v3945_v47 = vpop.permute.xlu0 %1802 }
 0x1e0   : > { %v3057_v44 = vpop.f32.mrb[79].mxu1 }
 0x1e1   : > { %v1392_v10 = vadd.f32 %v3055_v5, %v3931_v29  ;;  %v3058_v46 = vadd.f32 %v3057_v44, %v3056_v43  ;;  %v3943_v40 = vpop.permute.xlu1 %1807 }
 0x1e3   : > { %v1395_v48 = vadd.f32 %v3058_v46, %v3933_v34  ;;  %3184 = vmatprep.mubr.f32.mxu0 %v1392_v10  ;;  %v3949_v52 = vpop.permute.xlu0 %1812 }
 0x1e5   : > { %3185 = vmatmul.mubr.f32.gmra.mrb[78].mxu0 %v1395_v48  ;;  %v3947_v45 = vpop.permute.xlu1 %1817 }
 0x1e7   : > { %v3953_v55 = vpop.permute.xlu0 %1822 }
 0x1e9   : > { %v3951_v29 = vpop.permute.xlu1 %1827 }
 0x1eb   : > { %v3957_v56 = vpop.permute.xlu0 %1832 }
 0x1ed   : > { %v3955_v34 = vpop.permute.xlu1 %1837 }
 0x1ef   : > { %v3961_v58 = vpop.permute.xlu0 %1842 }
 0x1f1   : > { %v3959_v57 = vpop.permute.xlu1 %1847 }
 0x1f3   : > { %v3965_v0 = vpop.permute.xlu0 %1852 }
 0x1f5   : > { %v3963_v61 = vpop.permute.xlu1 %1857 }
 0x1f7   : > { %v3969_v2 = vpop.permute.xlu0 %1862 }
 0x1f9   : > { %v3967_v1 = vpop.permute.xlu1 %1867 }
 0x1fb   : > { %v3973_v54 = vpop.permute.xlu0 %1872 }
 0x1fd   : > { %v3971_v53 = vpop.permute.xlu1 %1877 }
 0x1ff   : > { %v3977_v63 = vpop.permute.xlu0 %1882 }
 0x201   : > { %v3975_v3 = vpop.permute.xlu1 %1887 }
 0x203   : > { %v3981_v4 = vpop.permute.xlu0 %1892 }
 0x205   : > { %v3979_v60 = vpop.permute.xlu1 %1897 }
 0x207   : > { %v3985_v9 = vpop.permute.xlu0 %1902 }
 0x209   : > { %v3983_v8 = vpop.permute.xlu1 %1907 }
 0x20b   : > { %v3989_v7 = vpop.permute.xlu0 %1912 }
 0x20d   : > { %v3987_v11 = vpop.permute.xlu1 %1917 }
 0x20f   : > { %v3998_v18 = vpop.permute.xlu0 %1922 }
 0x211   : > { %v3991_v12 = vpop.permute.xlu1 %1927 }
 0x213   : > { %v2068_v26 = vpop.permute.xlu0 %2067 }
 0x215   : > { %v2073_v24 = vpop.permute.xlu1 %2072 }
 0x217   : > { %v2078_v38 = vpop.permute.xlu0 %2077 }
 0x219   : > { %v2083_v62 = vpop.permute.xlu1 %2082 }
 0x240   : > { %v3141_v14 = vpop.f32.mrb[48].mxu0 }
 0x241   : > { %v1931_v15 = vmul.f32 %v3141_v14, %v1778_v39  ;;  %v1579_v19 = vpop.f32.mrb[49].mxu0  ;;  %v2088_v14 = vpop.permute.xlu0 %2087 }
 0x242   : > { %v1930_v6 = vmul.f32 %v1773_v50, %v1579_v19 }
 0x243   : > { %v1970_v20 = vadd.f32 %v3996_v16, %v1931_v15 }
 0x244   : > { %v1969_v13 = vadd.f32 %v3996_v16, %v1930_v6 }
 0x245   : > { %v2002_v21 = vmax.f32 %v1970_v20, 0.0 }
 0x246   : > { %v2001_v25 = vmax.f32 %v1969_v13, 0.0 }
 0x247   : > { %v2226_v28 = vmul.f32 %v2073_v24, %v2002_v21 }
 0x248   : > { %v2225_v30 = vmul.f32 %v2068_v26, %v2001_v25  ;;  %v3144_v32 = vpop.f32.mrb[50].mxu0 }
 0x249   : > { %v1933_v35 = vmul.f32 %v3144_v32, %v1788_v17  ;;  %v1589_v36 = vpop.f32.mrb[51].mxu0  ;;  %v2093_v17 = vpop.permute.xlu1 %2092 }
 0x24a   : > { %v2743_v27 = vpack.c.bf16 %v2226_v28, %v2225_v30  ;;  %v1932_v37 = vmul.f32 %v1783_v49, %v1589_v36  ;;  %v2098_v30 = vpop.permute.xlu0 %2097 }
 0x24b   : > { %v1972_v59 = vadd.f32 %v3996_v16, %v1933_v35 }
 0x24c   : > { %2744 = vst [vmem:[%s4006_s15] sm:$0xff] %v2743_v27   ;;  %v1971_v23 = vadd.f32 %v3996_v16, %v1932_v37 }
 0x24d   : > { %v2004_v33 = vmax.f32 %v1972_v59, 0.0  ;;  %v2103_v26 = vpop.permute.xlu1 %2102 }
 0x24e   : > { %v2003_v31 = vmax.f32 %v1971_v23, 0.0 }
 0x24f   : > { %v2228_v41 = vmul.f32 %v2083_v62, %v2004_v33 }
 0x250   : > { %v2227_v42 = vmul.f32 %v2078_v38, %v2003_v31  ;;  %v3147_v5 = vpop.f32.mrb[52].mxu0  ;;  %v2108_v38 = vpop.permute.xlu0 %2107 }
 0x251   : > { %v1935_v43 = vmul.f32 %v3147_v5, %v1798_v51  ;;  %v1599_v44 = vpop.f32.mrb[53].mxu0  ;;  %v2113_v62 = vpop.permute.xlu1 %2112 }
 0x252   : > { %v2748_v10 = vpack.c.bf16 %v2228_v41, %v2227_v42  ;;  %v1934_v46 = vmul.f32 %v1793_v22, %v1599_v44 }
 0x253   : > { %v1974_v48 = vadd.f32 %v3996_v16, %v1935_v43 }
 0x254   : > { %2820 = vst [vmem:[%s4006_s15 + $0x8] sm:$0xff] %v2748_v10   ;;  %v1973_v49 = vadd.f32 %v3996_v16, %v1934_v46 }
 0x255   : > { %v2006_v50 = vmax.f32 %v1974_v48, 0.0 }
 0x256   : > { %v2005_v39 = vmax.f32 %v1973_v49, 0.0  ;;  %v2123_v49 = vpop.permute.xlu1 %2122 }
 0x257   : > { %v2230_v15 = vmul.f32 %v2093_v17, %v2006_v50  ;;  %v2118_v17 = vpop.permute.xlu0 %2117 }
 0x258   : > { %v2229_v19 = vmul.f32 %v2088_v14, %v2005_v39  ;;  %v3150_v6 = vpop.f32.mrb[54].mxu0 }
 0x259   : > { %v1937_v20 = vmul.f32 %v3150_v6, %v3943_v40  ;;  %v1609_v13 = vpop.f32.mrb[55].mxu0 }
 0x25a   : > { %v2753_v51 = vpack.c.bf16 %v2230_v15, %v2229_v19  ;;  %v1936_v21 = vmul.f32 %v3945_v47, %v1609_v13 }
 0x25b   : > { %v1976_v22 = vadd.f32 %v3996_v16, %v1937_v20 }
 0x25c   : > { %2821 = vst [vmem:[%s4006_s15 + $0x10] sm:$0xff] %v2753_v51   ;;  %v1975_v24 = vadd.f32 %v3996_v16, %v1936_v21  ;;  %v2133_v21 = vpop.permute.xlu1 %2132 }
 0x25d   : > { %v2008_v25 = vmax.f32 %v1976_v22, 0.0 }
 0x25e   : > { %v2007_v28 = vmax.f32 %v1975_v24, 0.0  ;;  %v2128_v24 = vpop.permute.xlu0 %2127 }
 0x25f   : > { %v2232_v32 = vmul.f32 %v2103_v26, %v2008_v25 }
 0x260   : > { %v2231_v35 = vmul.f32 %v2098_v30, %v2007_v28  ;;  %v3153_v36 = vpop.f32.mrb[56].mxu0 }
 0x261   : > { %v1939_v27 = vmul.f32 %v3153_v36, %v3947_v45  ;;  %v1619_v40 = vpop.f32.mrb[57].mxu0 }
 0x262   : > { %v2758_v37 = vpack.c.bf16 %v2232_v32, %v2231_v35  ;;  %v1938_v59 = vmul.f32 %v3949_v52, %v1619_v40  ;;  %v2143_v40 = vpop.permute.xlu1 %2142 }
 0x263   : > { %v1978_v47 = vadd.f32 %v3996_v16, %v1939_v27 }
 0x264   : > { %2822 = vst [vmem:[%s4006_s15 + $0x18] sm:$0xff] %v2758_v37   ;;  %v1977_v23 = vadd.f32 %v3996_v16, %v1938_v59  ;;  %v2138_v59 = vpop.permute.xlu0 %2137 }
 0x265   : > { %v2010_v33 = vmax.f32 %v1978_v47, 0.0 }
 0x266   : > { %v2009_v31 = vmax.f32 %v1977_v23, 0.0 }
 0x267   : > { %v2234_v41 = vmul.f32 %v2113_v62, %v2010_v33 }
 0x268   : > { %v2233_v42 = vmul.f32 %v2108_v38, %v2009_v31  ;;  %v3156_v5 = vpop.f32.mrb[58].mxu0 }
 0x269   : > { %v1941_v43 = vmul.f32 %v3156_v5, %v3951_v29  ;;  %v1629_v45 = vpop.f32.mrb[59].mxu0  ;;  %v2153_v5 = vpop.permute.xlu1 %2152 }
 0x26a   : > { %v2763_v44 = vpack.c.bf16 %v2234_v41, %v2233_v42  ;;  %v1940_v10 = vmul.f32 %v3953_v55, %v1629_v45  ;;  %v2148_v45 = vpop.permute.xlu0 %2147 }
 0x26b   : > { %v1980_v52 = vadd.f32 %v3996_v16, %v1941_v43 }
 0x26c   : > { %2823 = vst [vmem:[%s4006_s15 + $0x20] sm:$0xff] %v2763_v44   ;;  %v1979_v46 = vadd.f32 %v3996_v16, %v1940_v10 }
 0x26d   : > { %v2012_v48 = vmax.f32 %v1980_v52, 0.0 }
 0x26e   : > { %v2011_v50 = vmax.f32 %v1979_v46, 0.0 }
 0x26f   : > { %v2236_v39 = vmul.f32 %v2123_v49, %v2012_v48 }
 0x270   : > { %v2235_v14 = vmul.f32 %v2118_v17, %v2011_v50  ;;  %v3159_v15 = vpop.f32.mrb[60].mxu0 }
 0x271   : > { %v1943_v19 = vmul.f32 %v3159_v15, %v3955_v34  ;;  %v1639_v29 = vpop.f32.mrb[61].mxu0  ;;  %v2158_v15 = vpop.permute.xlu0 %2157 }
 0x272   : > { %v2768_v6 = vpack.c.bf16 %v2236_v39, %v2235_v14  ;;  %v1942_v20 = vmul.f32 %v3957_v56, %v1639_v29  ;;  %v2163_v39 = vpop.permute.xlu1 %2162 }
 0x273   : > { %v1982_v55 = vadd.f32 %v3996_v16, %v1943_v19 }
 0x274   : > { %2824 = vst [vmem:[%s4006_s15 + $0x28] sm:$0xff] %v2768_v6   ;;  %v1981_v13 = vadd.f32 %v3996_v16, %v1942_v20 }
 0x275   : > { %v2014_v51 = vmax.f32 %v1982_v55, 0.0 }
 0x276   : > { %v2013_v22 = vmax.f32 %v1981_v13, 0.0 }
 0x277   : > { %v2238_v25 = vmul.f32 %v2133_v21, %v2014_v51 }
 0x278   : > { %v2237_v26 = vmul.f32 %v2128_v24, %v2013_v22  ;;  %v3162_v28 = vpop.f32.mrb[62].mxu0  ;;  %v2173_v22 = vpop.permute.xlu1 %2172 }
 0x279   : > { %v1945_v30 = vmul.f32 %v3162_v28, %v3959_v57  ;;  %v1649_v34 = vpop.f32.mrb[63].mxu0 }
 0x27a   : > { %v2773_v32 = vpack.c.bf16 %v2238_v25, %v2237_v26  ;;  %v1944_v35 = vmul.f32 %v3961_v58, %v1649_v34  ;;  %v2168_v25 = vpop.permute.xlu0 %2167 }
 0x27b   : > { %v1984_v56 = vadd.f32 %v3996_v16, %v1945_v30 }
 0x27c   : > { %2825 = vst [vmem:[%s4006_s15 + $0x30] sm:$0xff] %v2773_v32   ;;  %v1983_v36 = vadd.f32 %v3996_v16, %v1944_v35 }
 0x27d   : > { %v2016_v27 = vmax.f32 %v1984_v56, 0.0 }
 0x27e   : > { %v2015_v37 = vmax.f32 %v1983_v36, 0.0 }
 0x27f   : > { %v2240_v47 = vmul.f32 %v2143_v40, %v2016_v27  ;;  %v2183_v27 = vpop.permute.xlu1 %2182 }
 0x280   : > { %v2239_v23 = vmul.f32 %v2138_v59, %v2015_v37  ;;  %v3165_v33 = vpop.f32.mrb[64].mxu0  ;;  %v2178_v37 = vpop.permute.xlu0 %2177 }
 0x281   : > { %v1947_v62 = vmul.f32 %v3165_v33, %v3963_v61  ;;  %v1659_v57 = vpop.f32.mrb[65].mxu0 }
 0x282   : > { %v2778_v31 = vpack.c.bf16 %v2240_v47, %v2239_v23  ;;  %v1946_v38 = vmul.f32 %v3965_v0, %v1659_v57 }
 0x283   : > { %v1986_v58 = vadd.f32 %v3996_v16, %v1947_v62 }
 0x284   : > { %2826 = vst [vmem:[%s4006_s15 + $0x38] sm:$0xff] %v2778_v31   ;;  %v1985_v41 = vadd.f32 %v3996_v16, %v1946_v38 }
 0x285   : > { %v2018_v42 = vmax.f32 %v1986_v58, 0.0  ;;  %v2193_v58 = vpop.permute.xlu1 %2192 }
 0x286   : > { %v2017_v43 = vmax.f32 %v1985_v41, 0.0 }
 0x287   : > { %v2242_v44 = vmul.f32 %v2153_v5, %v2018_v42  ;;  %v2188_v42 = vpop.permute.xlu0 %2187 }
 0x288   : > { %v2241_v10 = vmul.f32 %v2148_v45, %v2017_v43  ;;  %v3168_v52 = vpop.f32.mrb[66].mxu0 }
 0x289   : > { %v1949_v46 = vmul.f32 %v3168_v52, %v3967_v1  ;;  %v1669_v61 = vpop.f32.mrb[67].mxu0 }
 0x28a   : > { %v2783_v48 = vpack.c.bf16 %v2242_v44, %v2241_v10  ;;  %v1948_v49 = vmul.f32 %v3969_v2, %v1669_v61 }
 0x28b   : > { %v1988_v0 = vadd.f32 %v3996_v16, %v1949_v46 }
 0x28c   : > { %2827 = vst [vmem:[%s4006_s15 + $0x40] sm:$0xff] %v2783_v48   ;;  %v1987_v50 = vadd.f32 %v3996_v16, %v1948_v49  ;;  %v2203_v48 = vpop.permute.xlu1 %2202 }
 0x28d   : > { %v2020_v17 = vmax.f32 %v1988_v0, 0.0  ;;  %v2198_v0 = vpop.permute.xlu0 %2197 }
 0x28e   : > { %v2019_v14 = vmax.f32 %v1987_v50, 0.0 }
 0x28f   : > { %v2244_v19 = vmul.f32 %v2163_v39, %v2020_v17 }
 0x290   : > { %v2243_v29 = vmul.f32 %v2158_v15, %v2019_v14  ;;  %v3171_v6 = vpop.f32.mrb[68].mxu0 }
 0x291   : > { %v1951_v20 = vmul.f32 %v3171_v6, %v3971_v53  ;;  %v1679_v1 = vpop.f32.mrb[69].mxu0 }
 0x292   : > { %v2788_v55 = vpack.c.bf16 %v2244_v19, %v2243_v29  ;;  %v1950_v13 = vmul.f32 %v3973_v54, %v1679_v1 }
 0x293   : > { %v1990_v2 = vadd.f32 %v3996_v16, %v1951_v20  ;;  %v2213_v20 = vpop.permute.xlu1 %2212 }
 0x294   : > { %2828 = vst [vmem:[%s4006_s15 + $0x48] sm:$0xff] %v2788_v55   ;;  %v1989_v51 = vadd.f32 %v3996_v16, %v1950_v13  ;;  %v2208_v55 = vpop.permute.xlu0 %2207 }
 0x295   : > { %v2022_v21 = vmax.f32 %v1990_v2, 0.0 }
 0x296   : > { %v2021_v24 = vmax.f32 %v1989_v51, 0.0 }
 0x297   : > { %v2246_v26 = vmul.f32 %v2173_v22, %v2022_v21 }
 0x298   : > { %v2245_v28 = vmul.f32 %v2168_v25, %v2021_v24  ;;  %v3174_v30 = vpop.f32.mrb[70].mxu0 }
 0x299   : > { %v1953_v34 = vmul.f32 %v3174_v30, %v3975_v3  ;;  %v1689_v53 = vpop.f32.mrb[71].mxu0 }
 0x29a   : > { %v2793_v32 = vpack.c.bf16 %v2246_v26, %v2245_v28  ;;  %v1952_v35 = vmul.f32 %v3977_v63, %v1689_v53  ;;  %v2223_v28 = vpop.permute.xlu1 %2222 }
 0x29b   : > { %v1992_v54 = vadd.f32 %v3996_v16, %v1953_v34  ;;  %v2218_v34 = vpop.permute.xlu0 %2217 }
 0x29c   : > { %2829 = vst [vmem:[%s4006_s15 + $0x50] sm:$0xff] %v2793_v32   ;;  %v1991_v56 = vadd.f32 %v3996_v16, %v1952_v35 }
 0x29d   : > { %v2024_v36 = vmax.f32 %v1992_v54, 0.0 }
 0x29e   : > { %v2023_v40 = vmax.f32 %v1991_v56, 0.0 }
 0x29f   : > { %v2248_v59 = vmul.f32 %v2183_v27, %v2024_v36 }
 0x2a0   : > { %v2247_v47 = vmul.f32 %v2178_v37, %v2023_v40  ;;  %v3177_v23 = vpop.f32.mrb[72].mxu0 }
 0x2a1   : > { %v1955_v33 = vmul.f32 %v3177_v23, %v3979_v60  ;;  %v1699_v3 = vpop.f32.mrb[73].mxu0 }
 0x2a2   : > { %v2798_v62 = vpack.c.bf16 %v2248_v59, %v2247_v47  ;;  %v1954_v57 = vmul.f32 %v3981_v4, %v1699_v3 }
 0x2a3   : > { %v1994_v63 = vadd.f32 %v3996_v16, %v1955_v33 }
 0x2a4   : > { %2830 = vst [vmem:[%s4006_s15 + $0x58] sm:$0xff] %v2798_v62   ;;  %v1993_v31 = vadd.f32 %v3996_v16, %v1954_v57 }
 0x2a5   : > { %v2026_v38 = vmax.f32 %v1994_v63, 0.0 }
 0x2a6   : > { %v2025_v41 = vmax.f32 %v1993_v31, 0.0 }
 0x2a7   : > { %v2250_v5 = vmul.f32 %v2193_v58, %v2026_v38 }
 0x2a8   : > { %v2249_v43 = vmul.f32 %v2188_v42, %v2025_v41  ;;  %v3180_v45 = vpop.f32.mrb[74].mxu0 }
 0x2a9   : > { %v1957_v44 = vmul.f32 %v3180_v45, %v3983_v8  ;;  %v1709_v60 = vpop.f32.mrb[75].mxu0 }
 0x2aa   : > { %v2803_v10 = vpack.c.bf16 %v2250_v5, %v2249_v43  ;;  %v1956_v52 = vmul.f32 %v3985_v9, %v1709_v60 }
 0x2ab   : > { %v1996_v4 = vadd.f32 %v3996_v16, %v1957_v44 }
 0x2ac   : > { %2831 = vst [vmem:[%s4006_s15 + $0x60] sm:$0xff] %v2803_v10   ;;  %v1995_v46 = vadd.f32 %v3996_v16, %v1956_v52 }
 0x2ad   : > { %v2028_v61 = vmax.f32 %v1996_v4, 0.0 }
 0x2ae   : > { %v2027_v49 = vmax.f32 %v1995_v46, 0.0 }
 0x2af   : > { %v2252_v50 = vmul.f32 %v2203_v48, %v2028_v61 }
 0x2b0   : > { %v2251_v17 = vmul.f32 %v2198_v0, %v2027_v49  ;;  %v3183_v39 = vpop.f32.mrb[76].mxu0 }
 0x2b1   : > { %v1959_v14 = vmul.f32 %v3183_v39, %v3987_v11  ;;  %v1719_v8 = vpop.f32.mrb[77].mxu0 }
 0x2b2   : > { %v2808_v15 = vpack.c.bf16 %v2252_v50, %v2251_v17  ;;  %v1958_v19 = vmul.f32 %v3989_v7, %v1719_v8 }
 0x2b3   : > { %v1998_v9 = vadd.f32 %v3996_v16, %v1959_v14 }
 0x2b4   : > { %2832 = vst [vmem:[%s4006_s15 + $0x68] sm:$0xff] %v2808_v15   ;;  %v1997_v29 = vadd.f32 %v3996_v16, %v1958_v19 }
 0x2b5   : > { %v2030_v6 = vmax.f32 %v1998_v9, 0.0 }
 0x2b6   : > { %v2029_v1 = vmax.f32 %v1997_v29, 0.0 }
 0x2b7   : > { %v2254_v13 = vmul.f32 %v2213_v20, %v2030_v6 }
 0x2b8   : > { %v2253_v2 = vmul.f32 %v2208_v55, %v2029_v1  ;;  %v3186_v51 = vpop.f32.mrb[78].mxu0 }
 0x2b9   : > { %v1961_v11 = vmul.f32 %v3186_v51, %v3991_v12  ;;  %v1729_v21 = vpop.f32.mrb[79].mxu0 }
 0x2ba   : > { %v2813_v22 = vpack.c.bf16 %v2254_v13, %v2253_v2  ;;  %v1960_v7 = vmul.f32 %v3998_v18, %v1729_v21 }
 0x2bb   : > { %v2000_v24 = vadd.f32 %v3996_v16, %v1961_v11 }
 0x2bc   : > { %2833 = vst [vmem:[%s4006_s15 + $0x70] sm:$0xff] %v2813_v22   ;;  %v1999_v25 = vadd.f32 %v3996_v16, %v1960_v7 }
 0x2bd   : > { %v2032_v26 = vmax.f32 %v2000_v24, 0.0 }
 0x2be   : > { %v2031_v30 = vmax.f32 %v1999_v25, 0.0 }
 0x2bf   : > { %v2256_v53 = vmul.f32 %v2223_v28, %v2032_v26 }
 0x2c0   : > { %v2255_v12 = vmul.f32 %v2218_v34, %v2031_v30 }
 0x2c2   : > { %v2818_v16 = vpack.c.bf16 %v2256_v53, %v2255_v12 }
 0x2c4   : > { %2834 = vst [vmem:[%s4006_s15 + $0x78] sm:$0xff] %v2818_v16  }
 0x2c5   : > { %3517 = shalt.err (!%p3514_p6)
}
 0x2c6   : > { %s3518_s13 = scalar_lea.hbm %s4083_s20, 2048  ;;  %s3522_s29 = scalar_lea.hbm %s4142_s6, 4096 }
 0x2c7   : > { %p3519_p7 = scmp.ne.s32.totalorder %s4083_s20, %s3518_s13  ;;  %p3523_p0 = scmp.lt.u32.totalorder %s4083_s20, %s4142_s6 }
 0x2c8   : > { %p3524_p1 = scmp.lt.u32.totalorder %s3522_s29, %s3518_s13  ;;  %p3526_p4 = scmp.lt.u32.totalorder %s3518_s13, %s4083_s20 }
 0x2c9   : > { %p3520_p9 = pnand %p3519_p7, %p4158_p8 }
 0x2ca   : > { %p3525_p13 = por %p3524_p1, %p3523_p0 }
 0x2cb   : > { %p3521_p12 = pneg %p3520_p9 }
 0x2cc   : > { %p3527_p10 = por %p3526_p4, %p3525_p13 }
 0x2ce   : > { %p3528_p11 = pnand %p3527_p10, %p3521_p12 }
 0x2d0   : > { %3531 = shalt.err (!%p3528_p11)
}
 0x2d1   : > { %s3600_s15 = smov 64   ;;  %s3601_s11 = smov 4  }
 0x2d2   : > { %3243 = dma.vmem_to_hbm [thread:$0]  (%p4158_p8), %s4085_s12, 2048, %s4083_s20, %s4090_s27, %s3600_s15, %s3600_s15, %s3601_s11  }
 0x2d3 PF: > { %p3260_p2 = scmp.ge.s32.totalorder %s3590_s26, 2  ;;  %s2446_s17 = sand.u32 1, %s3570_s21  }
 0x2d4   : > { %p4159_p3 = scmp.ne.s32.totalorder %s4152_s9, 0  ;;  %s2447_s19 = scalar_lea.sflag [#allocation5], %s2446_s17 }
 0x2d6   : > { %p3253_p5 = pnand %p3260_p2, %p4159_p3 }
 0x2d8   : > { %3565 = dma.done.wait (!%p3253_p5), %s2447_s19, 2048  }
 0x2d9   : > { %3567 = vsyncadd (!%p3253_p5), %s2447_s19, 4294965248  ;;  %s21_s26 = sadd.s32 1, %s3590_s26   ;;  %s4160_s24 = sld [smem:[#allocation12_spill]] }
 0x2da   : > { %p18_p6 = scmp.ge.s32.totalorder %s21_s26, 4   ;;  %s4161_s25 = sld [smem:[#allocation13_spill]] }
 0x2db   : > { %s4162_s21 = smov %s3574_s22  ;;  %s4163_s22 = smov %s3578_s23 }
 0x2dc   : > { %s4164_s23 = smov %s3690_s10  ;;  %20 = sbr.rel (!%p18_p6) target bundleno = 6 (0x6), region = 103 }
 0x2e3   :  { %2452 = vsyncpa [#allocation4], 1 }
 0x2e4   :  { %2454 = vsyncpa [#allocation4 + $0x1], 1 }
 0x2e5   :  { %2455 = vsyncpa [#allocation7], 1 }
 0x2e6   :  { %2456 = vsyncpa [#allocation5], 1 }
 0x2e7   :  { %2458 = vsyncpa [#allocation5 + $0x1], 1 }

</bundles_post_ra>
